<compile_context>
chip_gen: v7x
topology: tpu7x:2x2x1
jax: 0.10.0
libtpu: 0.0.40
codegen_flags: <defaults>
</compile_context>

<pallas_src>
import numpy as np
import jax
import jax.numpy as jnp
from jax import lax
from jax.experimental import pallas as pl
from jax.experimental.pallas import tpu as pltpu

_MM_PRECISION = jax.lax.Precision.HIGHEST


def simple_rnn_kernel(tok_ref,   # VMEM (max_len, tile_b) int32: token ids, batch on lanes
                      len_ref,   # VMEM (1, tile_b)       int32: valid lengths per sequence
                      whx_ref,   # VMEM (n_hid, n_in)  f32: comb2hid weight, one-hot columns
                      whh_ref,   # VMEM (n_hid, n_hid) f32: comb2hid weight, hidden columns
                      bh_ref,    # VMEM (n_hid, 1)     f32
                      wox_ref,   # VMEM (n_out, n_in)  f32: comb2out weight, one-hot columns
                      woh_ref,   # VMEM (n_out, n_hid) f32: comb2out weight, hidden columns
                      bo_ref,    # VMEM (n_out, 1)     f32
                      out_ref):  # VMEM (n_out, tile_b) f32: per-sequence log-probs (transposed)
    max_len, tile_b = tok_ref.shape
    n_hid, n_in = whx_ref.shape

    # Hoisted single loads: everything the recurrence touches lives in vregs.
    whx = whx_ref[...]            # (n_hid, n_in)
    whh = whh_ref[...]            # (n_hid, n_hid)
    bh = bh_ref[...]              # (n_hid, 1)
    toks = tok_ref[...]           # (max_len, tile_b) int32  (1 vreg)
    lens = len_ref[...]           # (1, tile_b) int32

    vocab = lax.broadcasted_iota(jnp.int32, (n_in, tile_b), 0)

    h = jnp.zeros((n_hid, tile_b), jnp.float32)       # hidden_t, batch on lanes
    last_oh = jnp.zeros((n_in, tile_b), jnp.float32)  # onehot(x_{L-1}), batch on lanes

    # Fully-unrolled static recurrence (max_len is tiny and static).
    # hidden_{t+1} = comb2hid([onehot(x_t), hidden_t]) is applied only while
    # t <= L-2 (per row), so h ends as hidden_{L-1} -- the value that sits
    # inside the LAST `combined` used by the output head.
    for t in range(max_len):
        tok_t = toks[t:t + 1, :]                               # (1, tile_b)
        onehot_t = (vocab == tok_t).astype(jnp.float32)        # (n_in, tile_b)
        # Remember the one-hot of the last valid token (position L-1).
        last_oh = jnp.where(lens == t + 1, onehot_t, last_oh)
        h_new = (jnp.dot(whx, onehot_t, preferred_element_type=jnp.float32,
                         precision=_MM_PRECISION)
                 + jnp.dot(whh, h, preferred_element_type=jnp.float32,
                           precision=_MM_PRECISION)
                 + bh)
        h = jnp.where(lens > t + 1, h_new, h)                  # branchless per-row mask

    # logit^T = Wox @ onehot(x_{L-1}) + Woh @ hidden_{L-1} + bo
    # (rows with L == 0 -- impossible in PyTorch, which would crash -- get bo.)
    logit = (jnp.dot(wox_ref[...], last_oh, preferred_element_type=jnp.float32,
                     precision=_MM_PRECISION)
             + jnp.dot(woh_ref[...], h, preferred_element_type=jnp.float32,
                       precision=_MM_PRECISION)
             + bo_ref[...])                                     # (n_out, tile_b)

    # log_softmax over the class axis (sublane axis here), numerically stable.
    m = jnp.max(logit, axis=0, keepdims=True)
    shifted = logit - m
    lse = jnp.log(jnp.sum(jnp.exp(shifted), axis=0, keepdims=True))
    out_ref[...] = shifted - lse        # lane-dense (n_out, 128) store, unmasked


def simple_rnn_forward(tokens, lengths, w_hid, b_hid, w_out, b_out, n_in,
                       *, tile_b=128):
    """Batched SimpleRNN forward.

    tokens : (B, max_len) int token ids (or (max_len,) for a single sequence)
    lengths: (B,) valid lengths (or scalar)
    w_hid  : (n_hid, n_in + n_hid) PyTorch-Linear weight of comb2hid
    b_hid  : (n_hid,)
    w_out  : (n_out, n_in + n_hid) PyTorch-Linear weight of comb2out
    b_out  : (n_out,)
    Returns (B, n_out) log-probabilities; row b == SimpleRNN.forward on sequence b.
    """
    tokens = jnp.asarray(tokens, jnp.int32)
    if tokens.ndim == 1:
        tokens = tokens[None, :]
    lengths = jnp.asarray(lengths, jnp.int32).reshape(-1)

    B, max_len = tokens.shape
    n_hid = w_hid.shape[0]
    n_out = w_out.shape[0]

    # Split the fused Linear weights into one-hot / hidden halves (PyTorch keeps
    # weights as (out_features, in_features), which is exactly the feature-major
    # layout the kernel wants -- no transposes needed).
    w_hid = jnp.asarray(w_hid, jnp.float32)
    w_out = jnp.asarray(w_out, jnp.float32)
    whx = w_hid[:, :n_in]                         # (n_hid, n_in)
    whh = w_hid[:, n_in:]                         # (n_hid, n_hid)
    bh = jnp.asarray(b_hid, jnp.float32).reshape(n_hid, 1)
    wox = w_out[:, :n_in]                         # (n_out, n_in)
    woh = w_out[:, n_in:]                         # (n_out, n_hid)
    bo = jnp.asarray(b_out, jnp.float32).reshape(n_out, 1)

    # Pad the batch to a multiple of the tile; padded rows get length 0 and are
    # sliced off afterwards.
    bp = pl.cdiv(B, tile_b) * tile_b
    if bp != B:
        tokens = jnp.pad(tokens, ((0, bp - B), (0, 0)))
        lengths = jnp.pad(lengths, (0, bp - B))
    tok_fm = tokens.T                             # (max_len, bp): batch on lanes
    len_fm = lengths.reshape(1, bp)               # (1, bp)

    resident = lambda i: (0, 0)                   # weights stay VMEM-resident
    grid = (bp // tile_b,)

    out = pl.pallas_call(
        simple_rnn_kernel,
        out_shape=jax.ShapeDtypeStruct((n_out, bp), jnp.float32),
        grid_spec=pltpu.PrefetchScalarGridSpec(
            num_scalar_prefetch=0,
            grid=grid,
            in_specs=[
                pl.BlockSpec((max_len, tile_b), lambda i: (0, i)),   # tokens
                pl.BlockSpec((1, tile_b), lambda i: (0, i)),         # lengths
                pl.BlockSpec((n_hid, n_in), resident),               # whx
                pl.BlockSpec((n_hid, n_hid), resident),              # whh
                pl.BlockSpec((n_hid, 1), resident),                  # bh
                pl.BlockSpec((n_out, n_in), resident),               # wox
                pl.BlockSpec((n_out, n_hid), resident),              # woh
                pl.BlockSpec((n_out, 1), resident),                  # bo
            ],
            out_specs=pl.BlockSpec((n_out, tile_b), lambda i: (0, i)),
        ),
        compiler_params=pltpu.CompilerParams(
            dimension_semantics=("parallel",)),   # batch tiles split across TCs on v7x
    )(tok_fm, len_fm, whx, whh, bh, wox, woh, bo)

    return out[:, :B].T                           # (B, n_out)


def simple_rnn_reference(tokens, lengths, w_hid, b_hid, w_out, b_out, n_in):
    """Pure-numpy per-sequence reference mirroring the PyTorch forward exactly."""
    tokens = np.asarray(tokens)
    lengths = np.asarray(lengths)
    w_hid = np.asarray(w_hid, np.float32)
    b_hid = np.asarray(b_hid, np.float32)
    w_out = np.asarray(w_out, np.float32)
    b_out = np.asarray(b_out, np.float32)
    B = tokens.shape[0]
    n_hid = w_hid.shape[0]
    n_out = w_out.shape[0]

    outs = np.zeros((B, n_out), np.float32)
    for b in range(B):
        L = int(lengths[b])
        hid = np.zeros((1, n_hid), np.float32)
        combined = np.zeros((1, n_in + n_hid), np.float32)
        for t in range(L):
            oh = np.zeros((1, n_in), np.float32)
            oh[0, int(tokens[b, t])] = 1.0
            combined = np.concatenate([oh, hid], axis=1)
            hid = combined @ w_hid.T + b_hid
        logit = combined @ w_out.T + b_out
        logit = logit - logit.max(axis=1, keepdims=True)
        outs[b] = (logit - np.log(np.exp(logit).sum(axis=1, keepdims=True)))[0]
    return outs


if __name__ == "__main__":
    # Small shapes implied by the module.
    n_in, n_hid, n_out = 16, 32, 8
    max_len, B = 8, 256
    padding_idx = 0  # unused by forward()

    key = jax.random.PRNGKey(0)
    k1, k2, k3, k4, k5, k6 = jax.random.split(key, 6)

    # PyTorch nn.Linear-style init: uniform +/- 1/sqrt(fan_in), stored (out, in).
    fan_in = n_in + n_hid
    bound = 1.0 / np.sqrt(fan_in)
    w_hid = jax.random.uniform(k1, (n_hid, fan_in), jnp.float32, -bound, bound)
    b_hid = jax.random.uniform(k2, (n_hid,), jnp.float32, -bound, bound)
    w_out = jax.random.uniform(k3, (n_out, fan_in), jnp.float32, -bound, bound)
    b_out = jax.random.uniform(k4, (n_out,), jnp.float32, -bound, bound)

    # B independent sequences (each one corresponds to one xss of shape (1, max_len)).
    tokens = jax.random.randint(k5, (B, max_len), 0, n_in, dtype=jnp.int32)
    lengths = jax.random.randint(k6, (B,), 1, max_len + 1, dtype=jnp.int32)
    lengths = lengths.at[0].set(1).at[1].set(max_len)   # cover the edge lengths

    out = simple_rnn_forward(tokens, lengths, w_hid, b_hid, w_out, b_out, n_in)
    out = jax.block_until_ready(out)

    ref = simple_rnn_reference(tokens, lengths, w_hid, b_hid, w_out, b_out, n_in)
    np.testing.assert_allclose(np.asarray(out), ref, rtol=1e-3, atol=1e-3)

    print("KERNEL_OK")
</pallas_src>

<mosaic_0001>
module attributes {stable_mosaic.version = 11 : i64} {
  func.func @simple_rnn_kernel(%arg0: i32, %arg1: memref<8x128xi32, #tpu.memory_space<vmem>>, %arg2: memref<1x128xi32, #tpu.memory_space<vmem>>, %arg3: memref<32x16xf32, #tpu.memory_space<vmem>>, %arg4: memref<32x32xf32, #tpu.memory_space<vmem>>, %arg5: memref<32x1xf32, #tpu.memory_space<vmem>>, %arg6: memref<8x16xf32, #tpu.memory_space<vmem>>, %arg7: memref<8x32xf32, #tpu.memory_space<vmem>>, %arg8: memref<8x1xf32, #tpu.memory_space<vmem>>, %arg9: memref<8x128xf32, #tpu.memory_space<vmem>>) attributes {dimension_semantics = [#tpu.dimension_semantics<parallel>], iteration_bounds = array<i64: 2>, scalar_prefetch = 0 : i64, scratch_operands = 0 : i64, tpu.core_type = #tpu.core_type<tc>, window_params = [{transform_indices = @transform_0, window_bounds = array<i64: 8, 128>}, {transform_indices = @transform_1, window_bounds = array<i64: 1, 128>}, {pipeline_mode = #tpu.pipeline_mode<synchronous>, transform_indices = @transform_2, window_bounds = array<i64: 32, 16>}, {pipeline_mode = #tpu.pipeline_mode<synchronous>, transform_indices = @transform_3, window_bounds = array<i64: 32, 32>}, {pipeline_mode = #tpu.pipeline_mode<synchronous>, transform_indices = @transform_4, window_bounds = array<i64: 32, 1>}, {pipeline_mode = #tpu.pipeline_mode<synchronous>, transform_indices = @transform_5, window_bounds = array<i64: 8, 16>}, {pipeline_mode = #tpu.pipeline_mode<synchronous>, transform_indices = @transform_6, window_bounds = array<i64: 8, 32>}, {pipeline_mode = #tpu.pipeline_mode<synchronous>, transform_indices = @transform_7, window_bounds = array<i64: 8, 1>}, {transform_indices = @transform_8, window_bounds = array<i64: 8, 128>}]} {
    %c0 = arith.constant 0 : index
    %c0_0 = arith.constant 0 : index
    %0 = vector.load %arg3[%c0, %c0_0] : memref<32x16xf32, #tpu.memory_space<vmem>>, vector<32x16xf32>
    %c0_1 = arith.constant 0 : index
    %c0_2 = arith.constant 0 : index
    %1 = vector.load %arg4[%c0_1, %c0_2] : memref<32x32xf32, #tpu.memory_space<vmem>>, vector<32x32xf32>
    %c0_3 = arith.constant 0 : index
    %c0_4 = arith.constant 0 : index
    %2 = vector.load %arg5[%c0_3, %c0_4] : memref<32x1xf32, #tpu.memory_space<vmem>>, vector<32x1xf32>
    %c0_5 = arith.constant 0 : index
    %c0_6 = arith.constant 0 : index
    %3 = vector.load %arg1[%c0_5, %c0_6] : memref<8x128xi32, #tpu.memory_space<vmem>>, vector<8x128xi32>
    %c0_7 = arith.constant 0 : index
    %c0_8 = arith.constant 0 : index
    %4 = vector.load %arg2[%c0_7, %c0_8] : memref<1x128xi32, #tpu.memory_space<vmem>>, vector<1x128xi32>
    %5 = tpu.iota {dimensions = array<i32: 0>} : vector<16x128xi32>
    %cst = arith.constant 0.000000e+00 : f32
    %6 = vector.broadcast %cst : f32 to vector<32x128xf32>
    %cst_9 = arith.constant 0.000000e+00 : f32
    %7 = vector.broadcast %cst_9 : f32 to vector<16x128xf32>
    %8 = vector.extract_strided_slice %3 {offsets = [0, 0], sizes = [1, 128], strides = [1, 1]} : vector<8x128xi32> to vector<1x128xi32>
    %9 = vector.broadcast %8 : vector<1x128xi32> to vector<16x128xi32>
    %10 = arith.cmpi eq, %5, %9 : vector<16x128xi32>
    %11 = arith.extui %10 : vector<16x128xi1> to vector<16x128xi32>
    %12 = arith.sitofp %11 : vector<16x128xi32> to vector<16x128xf32>
    %c1_i32 = arith.constant 1 : i32
    %13 = vector.broadcast %c1_i32 : i32 to vector<1x128xi32>
    %14 = arith.cmpi eq, %4, %13 : vector<1x128xi32>
    %15 = vector.shape_cast %14 : vector<1x128xi1> to vector<1x128xi1>
    %16 = vector.broadcast %15 : vector<1x128xi1> to vector<16x128xi1>
    %17 = arith.select %16, %12, %7 : vector<16x128xi1>, vector<16x128xf32>
    %cst_10 = arith.constant dense<0.000000e+00> : vector<32x128xf32>
    %18 = tpu.matmul %0, %12, %cst_10 {dimension_numbers = #tpu.dot_dimension_numbers<[1], [0], [0], [1], [0, 0, 1, 1], [], []>, precision = #tpu.contract_precision<fp32>} : vector<32x16xf32>, vector<16x128xf32>, vector<32x128xf32> -> vector<32x128xf32>
    %cst_11 = arith.constant dense<0.000000e+00> : vector<32x128xf32>
    %19 = tpu.matmul %1, %6, %cst_11 {dimension_numbers = #tpu.dot_dimension_numbers<[1], [0], [0], [1], [0, 0, 1, 1], [], []>, precision = #tpu.contract_precision<fp32>} : vector<32x32xf32>, vector<32x128xf32>, vector<32x128xf32> -> vector<32x128xf32>
    %20 = arith.addf %18, %19 : vector<32x128xf32>
    %21 = vector.broadcast %2 : vector<32x1xf32> to vector<32x128xf32>
    %22 = arith.addf %20, %21 : vector<32x128xf32>
    %c1_i32_12 = arith.constant 1 : i32
    %23 = vector.broadcast %c1_i32_12 : i32 to vector<1x128xi32>
    %24 = arith.cmpi sgt, %4, %23 : vector<1x128xi32>
    %25 = vector.shape_cast %24 : vector<1x128xi1> to vector<1x128xi1>
    %26 = vector.broadcast %25 : vector<1x128xi1> to vector<32x128xi1>
    %27 = arith.select %26, %22, %6 : vector<32x128xi1>, vector<32x128xf32>
    %28 = vector.extract_strided_slice %3 {offsets = [1, 0], sizes = [1, 128], strides = [1, 1]} : vector<8x128xi32> to vector<1x128xi32>
    %29 = vector.broadcast %28 : vector<1x128xi32> to vector<16x128xi32>
    %30 = arith.cmpi eq, %5, %29 : vector<16x128xi32>
    %31 = arith.extui %30 : vector<16x128xi1> to vector<16x128xi32>
    %32 = arith.sitofp %31 : vector<16x128xi32> to vector<16x128xf32>
    %c2_i32 = arith.constant 2 : i32
    %33 = vector.broadcast %c2_i32 : i32 to vector<1x128xi32>
    %34 = arith.cmpi eq, %4, %33 : vector<1x128xi32>
    %35 = vector.shape_cast %34 : vector<1x128xi1> to vector<1x128xi1>
    %36 = vector.broadcast %35 : vector<1x128xi1> to vector<16x128xi1>
    %37 = arith.select %36, %32, %17 : vector<16x128xi1>, vector<16x128xf32>
    %cst_13 = arith.constant dense<0.000000e+00> : vector<32x128xf32>
    %38 = tpu.matmul %0, %32, %cst_13 {dimension_numbers = #tpu.dot_dimension_numbers<[1], [0], [0], [1], [0, 0, 1, 1], [], []>, precision = #tpu.contract_precision<fp32>} : vector<32x16xf32>, vector<16x128xf32>, vector<32x128xf32> -> vector<32x128xf32>
    %cst_14 = arith.constant dense<0.000000e+00> : vector<32x128xf32>
    %39 = tpu.matmul %1, %27, %cst_14 {dimension_numbers = #tpu.dot_dimension_numbers<[1], [0], [0], [1], [0, 0, 1, 1], [], []>, precision = #tpu.contract_precision<fp32>} : vector<32x32xf32>, vector<32x128xf32>, vector<32x128xf32> -> vector<32x128xf32>
    %40 = arith.addf %38, %39 : vector<32x128xf32>
    %41 = vector.broadcast %2 : vector<32x1xf32> to vector<32x128xf32>
    %42 = arith.addf %40, %41 : vector<32x128xf32>
    %c2_i32_15 = arith.constant 2 : i32
    %43 = vector.broadcast %c2_i32_15 : i32 to vector<1x128xi32>
    %44 = arith.cmpi sgt, %4, %43 : vector<1x128xi32>
    %45 = vector.shape_cast %44 : vector<1x128xi1> to vector<1x128xi1>
    %46 = vector.broadcast %45 : vector<1x128xi1> to vector<32x128xi1>
    %47 = arith.select %46, %42, %27 : vector<32x128xi1>, vector<32x128xf32>
    %48 = vector.extract_strided_slice %3 {offsets = [2, 0], sizes = [1, 128], strides = [1, 1]} : vector<8x128xi32> to vector<1x128xi32>
    %49 = vector.broadcast %48 : vector<1x128xi32> to vector<16x128xi32>
    %50 = arith.cmpi eq, %5, %49 : vector<16x128xi32>
    %51 = arith.extui %50 : vector<16x128xi1> to vector<16x128xi32>
    %52 = arith.sitofp %51 : vector<16x128xi32> to vector<16x128xf32>
    %c3_i32 = arith.constant 3 : i32
    %53 = vector.broadcast %c3_i32 : i32 to vector<1x128xi32>
    %54 = arith.cmpi eq, %4, %53 : vector<1x128xi32>
    %55 = vector.shape_cast %54 : vector<1x128xi1> to vector<1x128xi1>
    %56 = vector.broadcast %55 : vector<1x128xi1> to vector<16x128xi1>
    %57 = arith.select %56, %52, %37 : vector<16x128xi1>, vector<16x128xf32>
    %cst_16 = arith.constant dense<0.000000e+00> : vector<32x128xf32>
    %58 = tpu.matmul %0, %52, %cst_16 {dimension_numbers = #tpu.dot_dimension_numbers<[1], [0], [0], [1], [0, 0, 1, 1], [], []>, precision = #tpu.contract_precision<fp32>} : vector<32x16xf32>, vector<16x128xf32>, vector<32x128xf32> -> vector<32x128xf32>
    %cst_17 = arith.constant dense<0.000000e+00> : vector<32x128xf32>
    %59 = tpu.matmul %1, %47, %cst_17 {dimension_numbers = #tpu.dot_dimension_numbers<[1], [0], [0], [1], [0, 0, 1, 1], [], []>, precision = #tpu.contract_precision<fp32>} : vector<32x32xf32>, vector<32x128xf32>, vector<32x128xf32> -> vector<32x128xf32>
    %60 = arith.addf %58, %59 : vector<32x128xf32>
    %61 = vector.broadcast %2 : vector<32x1xf32> to vector<32x128xf32>
    %62 = arith.addf %60, %61 : vector<32x128xf32>
    %c3_i32_18 = arith.constant 3 : i32
    %63 = vector.broadcast %c3_i32_18 : i32 to vector<1x128xi32>
    %64 = arith.cmpi sgt, %4, %63 : vector<1x128xi32>
    %65 = vector.shape_cast %64 : vector<1x128xi1> to vector<1x128xi1>
    %66 = vector.broadcast %65 : vector<1x128xi1> to vector<32x128xi1>
    %67 = arith.select %66, %62, %47 : vector<32x128xi1>, vector<32x128xf32>
    %68 = vector.extract_strided_slice %3 {offsets = [3, 0], sizes = [1, 128], strides = [1, 1]} : vector<8x128xi32> to vector<1x128xi32>
    %69 = vector.broadcast %68 : vector<1x128xi32> to vector<16x128xi32>
    %70 = arith.cmpi eq, %5, %69 : vector<16x128xi32>
    %71 = arith.extui %70 : vector<16x128xi1> to vector<16x128xi32>
    %72 = arith.sitofp %71 : vector<16x128xi32> to vector<16x128xf32>
    %c4_i32 = arith.constant 4 : i32
    %73 = vector.broadcast %c4_i32 : i32 to vector<1x128xi32>
    %74 = arith.cmpi eq, %4, %73 : vector<1x128xi32>
    %75 = vector.shape_cast %74 : vector<1x128xi1> to vector<1x128xi1>
    %76 = vector.broadcast %75 : vector<1x128xi1> to vector<16x128xi1>
    %77 = arith.select %76, %72, %57 : vector<16x128xi1>, vector<16x128xf32>
    %cst_19 = arith.constant dense<0.000000e+00> : vector<32x128xf32>
    %78 = tpu.matmul %0, %72, %cst_19 {dimension_numbers = #tpu.dot_dimension_numbers<[1], [0], [0], [1], [0, 0, 1, 1], [], []>, precision = #tpu.contract_precision<fp32>} : vector<32x16xf32>, vector<16x128xf32>, vector<32x128xf32> -> vector<32x128xf32>
    %cst_20 = arith.constant dense<0.000000e+00> : vector<32x128xf32>
    %79 = tpu.matmul %1, %67, %cst_20 {dimension_numbers = #tpu.dot_dimension_numbers<[1], [0], [0], [1], [0, 0, 1, 1], [], []>, precision = #tpu.contract_precision<fp32>} : vector<32x32xf32>, vector<32x128xf32>, vector<32x128xf32> -> vector<32x128xf32>
    %80 = arith.addf %78, %79 : vector<32x128xf32>
    %81 = vector.broadcast %2 : vector<32x1xf32> to vector<32x128xf32>
    %82 = arith.addf %80, %81 : vector<32x128xf32>
    %c4_i32_21 = arith.constant 4 : i32
    %83 = vector.broadcast %c4_i32_21 : i32 to vector<1x128xi32>
    %84 = arith.cmpi sgt, %4, %83 : vector<1x128xi32>
    %85 = vector.shape_cast %84 : vector<1x128xi1> to vector<1x128xi1>
    %86 = vector.broadcast %85 : vector<1x128xi1> to vector<32x128xi1>
    %87 = arith.select %86, %82, %67 : vector<32x128xi1>, vector<32x128xf32>
    %88 = vector.extract_strided_slice %3 {offsets = [4, 0], sizes = [1, 128], strides = [1, 1]} : vector<8x128xi32> to vector<1x128xi32>
    %89 = vector.broadcast %88 : vector<1x128xi32> to vector<16x128xi32>
    %90 = arith.cmpi eq, %5, %89 : vector<16x128xi32>
    %91 = arith.extui %90 : vector<16x128xi1> to vector<16x128xi32>
    %92 = arith.sitofp %91 : vector<16x128xi32> to vector<16x128xf32>
    %c5_i32 = arith.constant 5 : i32
    %93 = vector.broadcast %c5_i32 : i32 to vector<1x128xi32>
    %94 = arith.cmpi eq, %4, %93 : vector<1x128xi32>
    %95 = vector.shape_cast %94 : vector<1x128xi1> to vector<1x128xi1>
    %96 = vector.broadcast %95 : vector<1x128xi1> to vector<16x128xi1>
    %97 = arith.select %96, %92, %77 : vector<16x128xi1>, vector<16x128xf32>
    %cst_22 = arith.constant dense<0.000000e+00> : vector<32x128xf32>
    %98 = tpu.matmul %0, %92, %cst_22 {dimension_numbers = #tpu.dot_dimension_numbers<[1], [0], [0], [1], [0, 0, 1, 1], [], []>, precision = #tpu.contract_precision<fp32>} : vector<32x16xf32>, vector<16x128xf32>, vector<32x128xf32> -> vector<32x128xf32>
    %cst_23 = arith.constant dense<0.000000e+00> : vector<32x128xf32>
    %99 = tpu.matmul %1, %87, %cst_23 {dimension_numbers = #tpu.dot_dimension_numbers<[1], [0], [0], [1], [0, 0, 1, 1], [], []>, precision = #tpu.contract_precision<fp32>} : vector<32x32xf32>, vector<32x128xf32>, vector<32x128xf32> -> vector<32x128xf32>
    %100 = arith.addf %98, %99 : vector<32x128xf32>
    %101 = vector.broadcast %2 : vector<32x1xf32> to vector<32x128xf32>
    %102 = arith.addf %100, %101 : vector<32x128xf32>
    %c5_i32_24 = arith.constant 5 : i32
    %103 = vector.broadcast %c5_i32_24 : i32 to vector<1x128xi32>
    %104 = arith.cmpi sgt, %4, %103 : vector<1x128xi32>
    %105 = vector.shape_cast %104 : vector<1x128xi1> to vector<1x128xi1>
    %106 = vector.broadcast %105 : vector<1x128xi1> to vector<32x128xi1>
    %107 = arith.select %106, %102, %87 : vector<32x128xi1>, vector<32x128xf32>
    %108 = vector.extract_strided_slice %3 {offsets = [5, 0], sizes = [1, 128], strides = [1, 1]} : vector<8x128xi32> to vector<1x128xi32>
    %109 = vector.broadcast %108 : vector<1x128xi32> to vector<16x128xi32>
    %110 = arith.cmpi eq, %5, %109 : vector<16x128xi32>
    %111 = arith.extui %110 : vector<16x128xi1> to vector<16x128xi32>
    %112 = arith.sitofp %111 : vector<16x128xi32> to vector<16x128xf32>
    %c6_i32 = arith.constant 6 : i32
    %113 = vector.broadcast %c6_i32 : i32 to vector<1x128xi32>
    %114 = arith.cmpi eq, %4, %113 : vector<1x128xi32>
    %115 = vector.shape_cast %114 : vector<1x128xi1> to vector<1x128xi1>
    %116 = vector.broadcast %115 : vector<1x128xi1> to vector<16x128xi1>
    %117 = arith.select %116, %112, %97 : vector<16x128xi1>, vector<16x128xf32>
    %cst_25 = arith.constant dense<0.000000e+00> : vector<32x128xf32>
    %118 = tpu.matmul %0, %112, %cst_25 {dimension_numbers = #tpu.dot_dimension_numbers<[1], [0], [0], [1], [0, 0, 1, 1], [], []>, precision = #tpu.contract_precision<fp32>} : vector<32x16xf32>, vector<16x128xf32>, vector<32x128xf32> -> vector<32x128xf32>
    %cst_26 = arith.constant dense<0.000000e+00> : vector<32x128xf32>
    %119 = tpu.matmul %1, %107, %cst_26 {dimension_numbers = #tpu.dot_dimension_numbers<[1], [0], [0], [1], [0, 0, 1, 1], [], []>, precision = #tpu.contract_precision<fp32>} : vector<32x32xf32>, vector<32x128xf32>, vector<32x128xf32> -> vector<32x128xf32>
    %120 = arith.addf %118, %119 : vector<32x128xf32>
    %121 = vector.broadcast %2 : vector<32x1xf32> to vector<32x128xf32>
    %122 = arith.addf %120, %121 : vector<32x128xf32>
    %c6_i32_27 = arith.constant 6 : i32
    %123 = vector.broadcast %c6_i32_27 : i32 to vector<1x128xi32>
    %124 = arith.cmpi sgt, %4, %123 : vector<1x128xi32>
    %125 = vector.shape_cast %124 : vector<1x128xi1> to vector<1x128xi1>
    %126 = vector.broadcast %125 : vector<1x128xi1> to vector<32x128xi1>
    %127 = arith.select %126, %122, %107 : vector<32x128xi1>, vector<32x128xf32>
    %128 = vector.extract_strided_slice %3 {offsets = [6, 0], sizes = [1, 128], strides = [1, 1]} : vector<8x128xi32> to vector<1x128xi32>
    %129 = vector.broadcast %128 : vector<1x128xi32> to vector<16x128xi32>
    %130 = arith.cmpi eq, %5, %129 : vector<16x128xi32>
    %131 = arith.extui %130 : vector<16x128xi1> to vector<16x128xi32>
    %132 = arith.sitofp %131 : vector<16x128xi32> to vector<16x128xf32>
    %c7_i32 = arith.constant 7 : i32
    %133 = vector.broadcast %c7_i32 : i32 to vector<1x128xi32>
    %134 = arith.cmpi eq, %4, %133 : vector<1x128xi32>
    %135 = vector.shape_cast %134 : vector<1x128xi1> to vector<1x128xi1>
    %136 = vector.broadcast %135 : vector<1x128xi1> to vector<16x128xi1>
    %137 = arith.select %136, %132, %117 : vector<16x128xi1>, vector<16x128xf32>
    %cst_28 = arith.constant dense<0.000000e+00> : vector<32x128xf32>
    %138 = tpu.matmul %0, %132, %cst_28 {dimension_numbers = #tpu.dot_dimension_numbers<[1], [0], [0], [1], [0, 0, 1, 1], [], []>, precision = #tpu.contract_precision<fp32>} : vector<32x16xf32>, vector<16x128xf32>, vector<32x128xf32> -> vector<32x128xf32>
    %cst_29 = arith.constant dense<0.000000e+00> : vector<32x128xf32>
    %139 = tpu.matmul %1, %127, %cst_29 {dimension_numbers = #tpu.dot_dimension_numbers<[1], [0], [0], [1], [0, 0, 1, 1], [], []>, precision = #tpu.contract_precision<fp32>} : vector<32x32xf32>, vector<32x128xf32>, vector<32x128xf32> -> vector<32x128xf32>
    %140 = arith.addf %138, %139 : vector<32x128xf32>
    %141 = vector.broadcast %2 : vector<32x1xf32> to vector<32x128xf32>
    %142 = arith.addf %140, %141 : vector<32x128xf32>
    %c7_i32_30 = arith.constant 7 : i32
    %143 = vector.broadcast %c7_i32_30 : i32 to vector<1x128xi32>
    %144 = arith.cmpi sgt, %4, %143 : vector<1x128xi32>
    %145 = vector.shape_cast %144 : vector<1x128xi1> to vector<1x128xi1>
    %146 = vector.broadcast %145 : vector<1x128xi1> to vector<32x128xi1>
    %147 = arith.select %146, %142, %127 : vector<32x128xi1>, vector<32x128xf32>
    %148 = vector.extract_strided_slice %3 {offsets = [7, 0], sizes = [1, 128], strides = [1, 1]} : vector<8x128xi32> to vector<1x128xi32>
    %149 = vector.broadcast %148 : vector<1x128xi32> to vector<16x128xi32>
    %150 = arith.cmpi eq, %5, %149 : vector<16x128xi32>
    %151 = arith.extui %150 : vector<16x128xi1> to vector<16x128xi32>
    %152 = arith.sitofp %151 : vector<16x128xi32> to vector<16x128xf32>
    %c8_i32 = arith.constant 8 : i32
    %153 = vector.broadcast %c8_i32 : i32 to vector<1x128xi32>
    %154 = arith.cmpi eq, %4, %153 : vector<1x128xi32>
    %155 = vector.shape_cast %154 : vector<1x128xi1> to vector<1x128xi1>
    %156 = vector.broadcast %155 : vector<1x128xi1> to vector<16x128xi1>
    %157 = arith.select %156, %152, %137 : vector<16x128xi1>, vector<16x128xf32>
    %cst_31 = arith.constant dense<0.000000e+00> : vector<32x128xf32>
    %158 = tpu.matmul %0, %152, %cst_31 {dimension_numbers = #tpu.dot_dimension_numbers<[1], [0], [0], [1], [0, 0, 1, 1], [], []>, precision = #tpu.contract_precision<fp32>} : vector<32x16xf32>, vector<16x128xf32>, vector<32x128xf32> -> vector<32x128xf32>
    %cst_32 = arith.constant dense<0.000000e+00> : vector<32x128xf32>
    %159 = tpu.matmul %1, %147, %cst_32 {dimension_numbers = #tpu.dot_dimension_numbers<[1], [0], [0], [1], [0, 0, 1, 1], [], []>, precision = #tpu.contract_precision<fp32>} : vector<32x32xf32>, vector<32x128xf32>, vector<32x128xf32> -> vector<32x128xf32>
    %160 = arith.addf %158, %159 : vector<32x128xf32>
    %161 = vector.broadcast %2 : vector<32x1xf32> to vector<32x128xf32>
    %162 = arith.addf %160, %161 : vector<32x128xf32>
    %c8_i32_33 = arith.constant 8 : i32
    %163 = vector.broadcast %c8_i32_33 : i32 to vector<1x128xi32>
    %164 = arith.cmpi sgt, %4, %163 : vector<1x128xi32>
    %165 = vector.shape_cast %164 : vector<1x128xi1> to vector<1x128xi1>
    %166 = vector.broadcast %165 : vector<1x128xi1> to vector<32x128xi1>
    %167 = arith.select %166, %162, %147 : vector<32x128xi1>, vector<32x128xf32>
    %c0_34 = arith.constant 0 : index
    %c0_35 = arith.constant 0 : index
    %168 = vector.load %arg6[%c0_34, %c0_35] : memref<8x16xf32, #tpu.memory_space<vmem>>, vector<8x16xf32>
    %cst_36 = arith.constant dense<0.000000e+00> : vector<8x128xf32>
    %169 = tpu.matmul %168, %157, %cst_36 {dimension_numbers = #tpu.dot_dimension_numbers<[1], [0], [0], [1], [0, 0, 1, 1], [], []>, precision = #tpu.contract_precision<fp32>} : vector<8x16xf32>, vector<16x128xf32>, vector<8x128xf32> -> vector<8x128xf32>
    %c0_37 = arith.constant 0 : index
    %c0_38 = arith.constant 0 : index
    %170 = vector.load %arg7[%c0_37, %c0_38] : memref<8x32xf32, #tpu.memory_space<vmem>>, vector<8x32xf32>
    %cst_39 = arith.constant dense<0.000000e+00> : vector<8x128xf32>
    %171 = tpu.matmul %170, %167, %cst_39 {dimension_numbers = #tpu.dot_dimension_numbers<[1], [0], [0], [1], [0, 0, 1, 1], [], []>, precision = #tpu.contract_precision<fp32>} : vector<8x32xf32>, vector<32x128xf32>, vector<8x128xf32> -> vector<8x128xf32>
    %172 = arith.addf %169, %171 : vector<8x128xf32>
    %c0_40 = arith.constant 0 : index
    %c0_41 = arith.constant 0 : index
    %173 = vector.load %arg8[%c0_40, %c0_41] : memref<8x1xf32, #tpu.memory_space<vmem>>, vector<8x1xf32>
    %174 = vector.broadcast %173 : vector<8x1xf32> to vector<8x128xf32>
    %175 = arith.addf %172, %174 : vector<8x128xf32>
    %cst_42 = arith.constant dense<0xFF800000> : vector<128xf32>
    %176 = vector.multi_reduction <maximumf>, %175, %cst_42 [0] : vector<8x128xf32> to vector<128xf32>
    %177 = vector.shape_cast %176 : vector<128xf32> to vector<1x128xf32>
    %178 = vector.broadcast %177 : vector<1x128xf32> to vector<8x128xf32>
    %179 = arith.subf %175, %178 : vector<8x128xf32>
    %180 = math.exp %179 : vector<8x128xf32>
    %cst_43 = arith.constant dense<0.000000e+00> : vector<128xf32>
    %181 = vector.multi_reduction <add>, %180, %cst_43 [0] : vector<8x128xf32> to vector<128xf32>
    %182 = vector.shape_cast %181 : vector<128xf32> to vector<1x128xf32>
    %183 = math.log %182 : vector<1x128xf32>
    %184 = vector.broadcast %183 : vector<1x128xf32> to vector<8x128xf32>
    %185 = arith.subf %179, %184 : vector<8x128xf32>
    %c0_44 = arith.constant 0 : index
    %c0_45 = arith.constant 0 : index
    %186 = vector.load %arg9[%c0_44, %c0_45] : memref<8x128xf32, #tpu.memory_space<vmem>>, vector<8x128xf32>
    tpu.vector_store %arg9[%c0_44, %c0_45], %185 {strides = array<i32>} : memref<8x128xf32, #tpu.memory_space<vmem>>, vector<8x128xf32>,
    return
  }
  func.func @transform_0(%arg0: i32) -> (i32, i32) {
    %c0_i32 = arith.constant 0 : i32
    %c0_i32_0 = arith.constant 0 : i32
    return %c0_i32, %arg0 : i32, i32
  }
  func.func @transform_1(%arg0: i32) -> (i32, i32) {
    %c0_i32 = arith.constant 0 : i32
    %c0_i32_0 = arith.constant 0 : i32
    return %c0_i32, %arg0 : i32, i32
  }
  func.func @transform_2(%arg0: i32) -> (i32, i32) {
    %c0_i32 = arith.constant 0 : i32
    %c0_i32_0 = arith.constant 0 : i32
    %c0_i32_1 = arith.constant 0 : i32
    return %c0_i32, %c0_i32_0 : i32, i32
  }
  func.func @transform_3(%arg0: i32) -> (i32, i32) {
    %c0_i32 = arith.constant 0 : i32
    %c0_i32_0 = arith.constant 0 : i32
    %c0_i32_1 = arith.constant 0 : i32
    return %c0_i32, %c0_i32_0 : i32, i32
  }
  func.func @transform_4(%arg0: i32) -> (i32, i32) {
    %c0_i32 = arith.constant 0 : i32
    %c0_i32_0 = arith.constant 0 : i32
    %c0_i32_1 = arith.constant 0 : i32
    return %c0_i32, %c0_i32_0 : i32, i32
  }
  func.func @transform_5(%arg0: i32) -> (i32, i32) {
    %c0_i32 = arith.constant 0 : i32
    %c0_i32_0 = arith.constant 0 : i32
    %c0_i32_1 = arith.constant 0 : i32
    return %c0_i32, %c0_i32_0 : i32, i32
  }
  func.func @transform_6(%arg0: i32) -> (i32, i32) {
    %c0_i32 = arith.constant 0 : i32
    %c0_i32_0 = arith.constant 0 : i32
    %c0_i32_1 = arith.constant 0 : i32
    return %c0_i32, %c0_i32_0 : i32, i32
  }
  func.func @transform_7(%arg0: i32) -> (i32, i32) {
    %c0_i32 = arith.constant 0 : i32
    %c0_i32_0 = arith.constant 0 : i32
    %c0_i32_1 = arith.constant 0 : i32
    return %c0_i32, %c0_i32_0 : i32, i32
  }
  func.func @transform_8(%arg0: i32) -> (i32, i32) {
    %c0_i32 = arith.constant 0 : i32
    %c0_i32_0 = arith.constant 0 : i32
    return %c0_i32, %arg0 : i32, i32
  }
}

</mosaic_0001>

<bundles_post_ra>
// kernel: tpu_custom_call.1
= control target key start
LH: loop header
LB: loop body
LE: loop exit
PB: predicated region body
PF: predicated region fallthrough
CT: control target
= control target key end

     0   :  { %13 = vsyncpa [#allocation3], 0  ;;  %s16044_s0 = inlined_call_operand.vmem [shape: s32[8,256], index: 0, kind: input, shape index: {}]   ;;  %s16045_s1 = inlined_call_operand.vmem [shape: s32[1,256], index: 1, kind: input, shape index: {}]   ;;  %s16046_s2 = inlined_call_operand.vmem [shape: f32[32,16], index: 2, kind: input, shape index: {}]   ;;  %s16047_s3 = inlined_call_operand.vmem [shape: f32[32,32], index: 3, kind: input, shape index: {}]   ;;  %s16048_s4 = inlined_call_operand.vmem [shape: f32[32,1], index: 4, kind: input, shape index: {}]   ;;  %s16049_s5 = inlined_call_operand.vmem [shape: f32[8,16], index: 5, kind: input, shape index: {}]   ;;  %s16050_s6 = inlined_call_operand.vmem [shape: f32[8,32], index: 6, kind: input, shape index: {}]   ;;  %s16051_s7 = inlined_call_operand.vmem [shape: f32[8,1], index: 7, kind: input, shape index: {}]   ;;  %s16052_s8 = inlined_call_operand.hbm [shape: f32[8,256], index: 8, kind: output, shape index: {}]  }
   0x1   :  { %15 = vsyncpa [#allocation3 + $0x1], 0  ;;  %s14375_s27 = smov 0   ;;  %s14377_s28 = smov 0  }
   0x2   :  { %s14379_s29 = smov 0   ;;  %s14381_s30 = smov 0  }
   0x3 LB: > { %s14396_s9 = sadd.s32 4294967295, %s14322_s30   ;;  %s11274_s10 = sadd.s32 4294967294, %s14322_s30   ;;  %s14322_s30 = sphi %s14381_s30, %s16224_s30   ;;  %s14318_s29 = sphi %s14379_s29, %s16223_s29   ;;  %s14314_s28 = sphi %s14377_s28, %s16222_s28   ;;  %s14310_s27 = sphi %s14375_s27, %s16221_s27  }
   0x4   : > { %s14400_s11 = sadd.s32 1, %s14322_s30   ;;  %s206_s12 = sadd.s32 1, %s14318_s29 }
   0x5   : > { %s203_s13 = ssub.s32 %s14322_s30, %s14400_s11  ;;  %p216_p0 = scmp.ne.s32.totalorder %s14318_s29, %s14314_s28 }
   0x6   : > { %p204_p1 = scmp.eq.s32.totalorder %s203_s13, 0  ;;  %p217_p2 = scmp.eq.s32.totalorder %s14396_s9, 1 }
   0x7   : > { %p222_p3 = scmp.ne.s32.totalorder %s14314_s28, %s14310_s27  ;;  %p223_p4 = scmp.eq.s32.totalorder %s11274_s10, 1 }
   0x8   : > { %s14411_s14 = scalar_select %p204_p1, %s14318_s29, %s206_s12  }
   0x9   : > { %p14413_p5 = por %p217_p2, %p216_p0  ;;  %p14417_p6 = por %p223_p4, %p222_p3 }
   0xa   : > { %p11277_p7 = scmp.ge.s32.totalorder %s14322_s30, 1  ;;  %p272_p8 = scmp.lt.s32.totalorder %s14322_s30, 3 }
   0xc   : > { %p273_p9 = pnand %p11277_p7, %p272_p8 }
   0xe   : > { %276 = sbr.rel (%p273_p9) target bundleno = 2881 (0xb41), region = 52 }
  0x15   : > { %v319_v0 = vld [vmem:[%s16047_s3] sm:$0xff]  ;;  %vm351_vm0 = vcmask 261120   ;;  %v320_v1 = vld [vmem:[%s16047_s3 + $0x8] sm:$0xff]  ;;  %v321_v2 = vld [vmem:[%s16047_s3 + $0x10] sm:$0xff]  ;;  %v16053_v3 = vmov 0.0   ;;  %v16055_v12 = vmov 0   ;;  %v329_v35 = vlaneseq }
  0x16   : > { %12050 = vmatprep.subr.mxu0 %v16053_v3  ;;  %v353_v4 = vsel %vm351_vm0, %v319_v0, 0  ;;  %v356_v5 = vsel %vm351_vm0, %v320_v1, 0  ;;  %v359_v6 = vsel %vm351_vm0, %v321_v2, 0  ;;  %v322_v7 = vld [vmem:[%s16047_s3 + $0x18] sm:$0xff]  ;;  %14252 = vset.pattern.permute.xlu0 %v16055_v12  ;;  %v323_v17 = vld [vmem:[%s16048_s4] sm:$0xff]  ;;  %v325_v19 = vld [vmem:[%s16048_s4 + $0x10] sm:$0xff] }
  0x17   : > { %12051 = vmatpush3.msra.mxu0 %v16053_v3  ;;  %v14440_v8 = vand.u32 4294901760, %v353_v4  ;;  %v14442_v9 = vand.u32 4294901760, %v356_v5  ;;  %v14444_v10 = vand.u32 4294901760, %v359_v6  ;;  %v362_v11 = vsel %vm351_vm0, %v322_v7, 0  ;;  %14253 = vset.pattern.permute.xlu1 %v16055_v12  ;;  %v324_v23 = vld [vmem:[%s16048_s4 + $0x8] sm:$0xff]  ;;  %v326_v25 = vld [vmem:[%s16048_s4 + $0x18] sm:$0xff] }
  0x18   : > { %12058 = vmatprep.subr.mxu0 %v16053_v3  ;;  %v14449_v13 = vand.u32 4294901760, %v362_v11  ;;  %1529 = vperm.xlu0 %14252, %v323_v17   ;;  %p308_p10 = scmp.lt.s32.totalorder %s14396_s9, 1  ;;  %v11166_v33 = vld [vmem:[%s16051_s7] sm:$0xff]  ;;  %v14519_v36 = vshrl.u32 %v329_v35, 7  ;;  %vm926_vm3 = vcmask 130048   ;;  %v316_v45 = vld [vmem:[%s16046_s2 + $0x8] sm:$0xff] }
  0x19   : > { %v14453_v14 = vsub.f32 %v353_v4, %v14440_v8  ;;  %v14456_v15 = vsub.f32 %v356_v5, %v14442_v9  ;;  %v14459_v16 = vsub.f32 %v359_v6, %v14444_v10  ;;  %1539 = vperm.xlu1 %14253, %v325_v19   ;;  %v315_v43 = vld [vmem:[%s16046_s2] sm:$0xff]  ;;  %v317_v48 = vld [vmem:[%s16046_s2 + $0x10] sm:$0xff]  ;;  %v931_v50 = vsel %vm926_vm3, %v316_v45, 0  ;;  %v318_v54 = vld [vmem:[%s16046_s2 + $0x18] sm:$0xff]  ;;  %s305_s13 = sand.u32 1, %s14314_s28   ;;  %s11345_s18 = sshll.u32 %s14396_s9, 7 }
  0x1a   : > { %v14465_v18 = vsub.f32 %v362_v11, %v14449_v13  ;;  %s14508_s22 = scalar_select %p308_p10, %s14396_s9, 1  ;;  %v14529_v37 = vsub.s32 0, %v14519_v36  ;;  %v14539_v39 = vadd.s32 8, %v14519_v36  ;;  %v928_v44 = vsel %vm926_vm3, %v315_v43, 0 }
  0x1b   : > { %v14471_v20 = vand.u32 4294901760, %v14453_v14  ;;  %v14474_v21 = vand.u32 4294901760, %v14456_v15  ;;  %v14477_v22 = vand.u32 4294901760, %v14459_v16  ;;  %v14583_v49 = vand.u32 4294901760, %v928_v44  ;;  %s11278_s17 = sshll.u32 %s305_s13, 3  ;;  %s16002_s24 = scalar_lea.hbm %s16052_s8, %s11345_s18 }
  0x1c   : > { %v14483_v24 = vand.u32 4294901760, %v14465_v18  ;;  %1534 = vperm.xlu0 %14252, %v324_v23   ;;  %s11279_s23 = sshll.u32 %s14508_s22, 3  ;;  %v934_v53 = vsel %vm926_vm3, %v317_v48, 0  ;;  %v14594_v55 = vand.u32 4294901760, %v931_v50  ;;  %v937_v58 = vsel %vm926_vm3, %v318_v54, 0  ;;  %s14709_s25 = scalar_lea.vmem %s16045_s1, %s14508_s22 }
  0x1d   : > { %v432_v26 = vsub.f32 %v14453_v14, %v14471_v20  ;;  %v442_v27 = vsub.f32 %v14456_v15, %v14474_v21  ;;  %v452_v28 = vsub.f32 %v14459_v16, %v14477_v22  ;;  %1544 = vperm.xlu1 %14253, %v326_v25   ;;  %s14525_s26 = scalar_lea.vmem %s16044_s0, %s11279_s23  ;;  %v14598_v56 = vsub.f32 %v928_v44, %v14583_v49  ;;  %v14712_v44 = vld [vmem:[%s14709_s25] sm:$0x1]  ;;  %s307_s19 = scalar_lea.vmem [#allocation2], %s11278_s17 }
  0x1e   : > { %v462_v29 = vsub.f32 %v14465_v18, %v14483_v24  ;;  %v14534_v38 = vld [vmem:[%s14525_s26] sm:$0xff]  ;;  %v14600_v57 = vand.u32 4294901760, %v934_v53  ;;  %v14615_v62 = vsub.f32 %v931_v50, %v14594_v55  ;;  %v14617_v63 = vand.u32 4294901760, %v937_v58  ;;  %s11206_s20 = sshll.u32 %s307_s19, 4  ;;  %s14329_s9 = smov [#allocation2]   ;;  %s16004_s20 = int_to_ptr.vmem [resolvable:$true] %s11206_s20 }
  0x1f   : > { %v14497_v30 = vand.u32 4294901760, %v432_v26  ;;  %v14499_v31 = vand.u32 4294901760, %v442_v27  ;;  %v14501_v32 = vand.u32 4294901760, %v452_v28  ;;  %v335_v40 = vrot.slane %v14534_v38, %v14529_v37  ;;  %s14260_s22 = scalar_lea.vmem %s16004_s20, 128 }
  0x20   : > { %v14512_v34 = vand.u32 4294901760, %v462_v29  ;;  %11169 = vperm.xlu0 %14252, %v11166_v33   ;;  %v14622_v0 = vand.u32 4294901760, %v14598_v56  ;;  %v14625_v1 = vsub.f32 %v934_v53, %v14600_v57  ;;  %v16057_v2 = vmov 1.0|1.0   ;;  %p14261_p11 = scmp.ne.s32.totalorder %s16004_s20, %s14260_s22 }
  0x21   : > { %12052 = vmatprep.mubr.f32.mxu0 %v14497_v30  ;;  %12166 = vmatprep.mubr.f32.mxu1 %v14497_v30  ;;  %vm336_vm1 = vcmp.eq.s32.totalorder %v14519_v36, %v335_v40  ;;  %vm337_vm2 = vcmp.eq.s32.totalorder %v14539_v39, %v335_v40  ;;  %v14632_v6 = vand.u32 4294901760, %v14615_v62  ;;  %v14635_v7 = vsub.f32 %v937_v58, %v14617_v63 }
  0x22   : > { %12053 = vmatmul.mubr.f32.vlgmr.msra.gmra.mrb[0].mxu0 %v14499_v31  ;;  %v14553_v41 = vsel %vm336_vm1, 1.0, %v16053_v3  ;;  %v14558_v42 = vsel %vm337_vm2, 1.0, %v16053_v3  ;;  %vm14609_vm4 = vmpackc.low %vm337_vm2, %vm336_vm1  ;;  %v1009_v11 = vsub.f32 %v14598_v56, %v14622_v0  ;;  %v14641_v17 = vand.u32 4294901760, %v14625_v1  ;;  %p14262_p12 = pnand %p14261_p11, %p14413_p5 }
  0x23   : > { %12059 = vmatpush3.msra.mxu0 %v16053_v3  ;;  %12055 = vmatprep.mubr.f32.mxu0 %v14501_v32  ;;  %v14571_v46 = vsub.f32 %v14553_v41, %v14553_v41  ;;  %v14575_v47 = vsub.f32 %v14558_v42, %v14558_v42  ;;  %v1019_v23 = vsub.f32 %v14615_v62, %v14632_v6  ;;  %v14647_v25 = vand.u32 4294901760, %v14635_v7 }
  0x24   : > { %12066 = vmatprep.subr.mxu0 %v16053_v3  ;;  %v14653_v26 = vand.u32 4294901760, %v1009_v11  ;;  %v1029_v27 = vsub.f32 %v14625_v1, %v14641_v17  ;;  %vm342_vm5 = vcmp.eq.s32.totalorder %v14712_v44, 1  ;;  %vm1572_vm7 = vcmp.eq.s32.totalorder %v14712_v44, 2  ;;  %p14263_p13 = pneg %p14262_p12 }
  0x25   : > { %v1049_v51 = vand.u32 4294901760, %v14571_v46  ;;  %v1056_v52 = vand.u32 4294901760, %v14575_v47  ;;  %v14658_v28 = vand.u32 4294901760, %v1019_v23  ;;  %v1039_v29 = vsub.f32 %v14635_v7, %v14647_v25 }
  0x26   : > { %12056 = vmatmul.mubr.f32.gmra.mrb[2].mxu0 %v14512_v34  ;;  %v14663_v33 = vand.u32 4294901760, %v1029_v27  ;;  %v13282_v35 = vpack.c.bf16 %v14575_v47, %v14571_v46  ;;  %v343_v45 = vsel %vm342_vm5, 1, %v16055_v12  ;;  %v1573_v50 = vsel %vm1572_vm7, 1, %v16055_v12 }
  0x27   : > { %12060 = vmatprep.mubr.f32.mxu0 %v14440_v8  ;;  %v1050_v59 = vsub.f32 %v14571_v46, %v1049_v51  ;;  %v1057_v60 = vsub.f32 %v14575_v47, %v1056_v52  ;;  %v14668_v40 = vand.u32 4294901760, %v1039_v29  ;;  %v13290_v43 = vpack.c.bf16 %v1056_v52, %v1049_v51 }
  0x28   : > { %v347_v46 = vrot.slane %v343_v45, %v14529_v37  ;;  %v1564_v47 = vsub.s32 1, %v14519_v36  ;;  %v1577_v53 = vrot.slane %v1573_v50, %v14529_v37  ;;  %vm1551_vm11 = vcmp.gt.s32.totalorder %v14712_v44, 1 }
  0x29   : > { %v1051_v4 = vand.u32 4294901760, %v1050_v59  ;;  %v1058_v5 = vand.u32 4294901760, %v1057_v60  ;;  %vm2808_vm14 = vcmp.eq.s32.totalorder %v14712_v44, 3  ;;  %vm4044_vm7 = vcmp.eq.s32.totalorder %v14712_v44, 4 }
  0x2a   : > { %12061 = vmatmul.mubr.f32.vlgmr.msra.gmra.mrb[0].mxu0 %v14442_v9  ;;  %v14719_v48 = vrot.slane %v14534_v38, %v1564_v47  ;;  %vm348_vm6 = vcmp.eq.s32.totalorder %v347_v46, 1  ;;  %vm1578_vm10 = vcmp.eq.s32.totalorder %v1577_v53, 1 }
  0x2b   : > { %12067 = vmatpush3.msra.mxu0 %v16053_v3  ;;  %12063 = vmatprep.mubr.f32.mxu0 %v14444_v10  ;;  %v13278_v19 = vpack.c.bf16 %v1058_v5, %v1051_v4  ;;  %v349_v51 = vsel %vm348_vm6, %v14553_v41, 0.0  ;;  %v350_v52 = vsel %vm348_vm6, %v14558_v42, 0.0  ;;  %v1552_v42 = vsel %vm1551_vm11, 1, %v16055_v12 }
  0x2c   : > { %12074 = vmatprep.subr.mxu0 %v16053_v3  ;;  %vm1566_vm8 = vcmp.eq.s32.totalorder %v14519_v36, %v14719_v48  ;;  %vm1567_vm9 = vcmp.eq.s32.totalorder %v14539_v39, %v14719_v48  ;;  %v1556_v61 = vrot.slane %v1552_v42, %v14529_v37  ;;  %vm4023_vm11 = vcmp.gt.s32.totalorder %v14712_v44, 3 }
  0x2d   : > { %v14734_v54 = vsel %vm1566_vm8, 1.0, %v16053_v3  ;;  %v14740_v58 = vsel %vm1567_vm9, 1.0, %v16053_v3  ;;  %vm14834_vm13 = vmpackc.low %vm1567_vm9, %vm1566_vm8 }
  0x2e   : > { %12064 = vmatmul.mubr.f32.gmra.mrb[2].mxu0 %v14449_v13  ;;  %v14743_v59 = vsel %vm1578_vm10, %v14734_v54, %v349_v51  ;;  %v14746_v41 = vsel %vm1578_vm10, %v14740_v58, %v350_v52  ;;  %vm14757_vm12 = vcmp.eq.s32.totalorder %v1556_v61, 1 }
  0x2f   : > { %12068 = vmatprep.mubr.f32.mxu0 %v14453_v14  ;;  %16101 = vst [vmem:[#allocation5_spill] sm:$0xff] %v14743_v59  ;;  %16102 = vst [vmem:[#allocation6_spill] sm:$0xff] %v14746_v41 }
  0x32   : > { %12069 = vmatmul.mubr.f32.vlgmr.msra.gmra.mrb[0].mxu0 %v14456_v15 }
  0x33   : > { %12075 = vmatpush3.msra.mxu0 %v16053_v3  ;;  %12071 = vmatprep.mubr.f32.mxu0 %v14459_v16 }
  0x34   : > { %12082 = vmatprep.subr.mxu0 %v16053_v3 }
  0x36   : > { %12072 = vmatmul.mubr.f32.gmra.mrb[2].mxu0 %v14465_v18 }
  0x37   : > { %12076 = vmatprep.mubr.f32.mxu0 %v14471_v20 }
  0x3a   : > { %12077 = vmatmul.mubr.f32.vlgmr.msra.gmra.mrb[0].mxu0 %v14474_v21 }
  0x3b   : > { %12083 = vmatpush3.msra.mxu0 %v16053_v3  ;;  %12079 = vmatprep.mubr.f32.mxu0 %v14477_v22 }
  0x3c   : > { %12090 = vmatprep.subr.mxu0 %v16053_v3 }
  0x3e   : > { %12080 = vmatmul.mubr.f32.gmra.mrb[2].mxu0 %v14483_v24 }
  0x3f   : > { %12084 = vmatprep.mubr.f32.mxu0 %v14440_v8 }
  0x42   : > { %12085 = vmatmul.mubr.f32.vlgmr.msra.gmra.mrb[0].mxu0 %v14442_v9 }
  0x43   : > { %12091 = vmatpush3.msra.mxu0 %v16053_v3  ;;  %12087 = vmatprep.mubr.f32.mxu0 %v14444_v10 }
  0x44   : > { %13275 = vmatprep.subr.msk.bf16.mxu0 %vm14609_vm4, %v16057_v2 }
  0x46   : > { %12088 = vmatmul.mubr.f32.gmra.mrb[2].mxu0 %v14449_v13 }
  0x47   : > { %12092 = vmatprep.mubr.f32.mxu0 %v14440_v8 }
  0x4a   : > { %12093 = vmatmul.mubr.f32.vlgmr.msra.gmra.mrb[0].mxu0 %v14442_v9 }
  0x4b   : > { %13277 = vmatpush3.bf16.msk.msra.mxu0 %vm14609_vm4, %v16057_v2  ;;  %12095 = vmatprep.mubr.f32.mxu0 %v14444_v10 }
  0x4c   : > { %13279 = vmatprep.subr.bf16.mxu0 %v13278_v19 }
  0x4e   : > { %12096 = vmatmul.mubr.f32.gmra.mrb[2].mxu0 %v14449_v13 }
  0x4f   : > { %12102 = vmatprep.mubr.f32.mxu0 %v14653_v26 }
  0x52   : > { %12103 = vmatmul.mubr.f32.vlgmr.msra.gmra.mrb[0].mxu0 %v14658_v28 }
  0x53   : > { %13281 = vmatpush3.bf16.msra.mxu0 %v13278_v19  ;;  %12105 = vmatprep.mubr.f32.mxu0 %v14663_v33 }
  0x54   : > { %13283 = vmatprep.subr.bf16.mxu0 %v13282_v35 }
  0x56   : > { %12106 = vmatmul.mubr.f32.gmra.mrb[2].mxu0 %v14668_v40 }
  0x57   : > { %12112 = vmatprep.mubr.f32.mxu0 %v14583_v49 }
  0x5a   : > { %12113 = vmatmul.mubr.f32.vlgmr.msra.gmra.mrb[0].mxu0 %v14594_v55 }
  0x5b   : > { %13285 = vmatpush3.bf16.msra.mxu0 %v13282_v35  ;;  %12115 = vmatprep.mubr.f32.mxu0 %v14600_v57 }
  0x5c   : > { %13287 = vmatprep.subr.msk.bf16.mxu0 %vm14609_vm4, %v16057_v2 }
  0x5e   : > { %12116 = vmatmul.mubr.f32.gmra.mrb[2].mxu0 %v14617_v63 }
  0x5f   : > { %12122 = vmatprep.mubr.f32.mxu0 %v14598_v56 }
  0x62   : > { %12123 = vmatmul.mubr.f32.vlgmr.msra.gmra.mrb[0].mxu0 %v14615_v62 }
  0x63   : > { %13289 = vmatpush3.bf16.msk.msra.mxu0 %vm14609_vm4, %v16057_v2  ;;  %12125 = vmatprep.mubr.f32.mxu0 %v14625_v1 }
  0x64   : > { %13291 = vmatprep.subr.bf16.mxu0 %v13290_v43 }
  0x66   : > { %12126 = vmatmul.mubr.f32.gmra.mrb[2].mxu0 %v14635_v7 }
  0x67   : > { %12132 = vmatprep.mubr.f32.mxu0 %v14622_v0 }
  0x6a   : > { %12133 = vmatmul.mubr.f32.vlgmr.msra.gmra.mrb[0].mxu0 %v14632_v6 }
  0x6b   : > { %13293 = vmatpush3.bf16.msra.mxu0 %v13290_v43  ;;  %12135 = vmatprep.mubr.f32.mxu0 %v14641_v17 }
  0x6c   : > { %13295 = vmatprep.subr.msk.bf16.mxu0 %vm14609_vm4, %v16057_v2 }
  0x6e   : > { %12136 = vmatmul.mubr.f32.gmra.mrb[2].mxu0 %v14647_v25 }
  0x6f   : > { %12142 = vmatprep.mubr.f32.mxu0 %v14583_v49 }
  0x72   : > { %12143 = vmatmul.mubr.f32.vlgmr.msra.gmra.mrb[0].mxu0 %v14594_v55 }
  0x73   : > { %13297 = vmatpush3.bf16.msk.msra.mxu0 %vm14609_vm4, %v16057_v2  ;;  %12145 = vmatprep.mubr.f32.mxu0 %v14600_v57  ;;  %vm2787_vm4 = vcmp.gt.s32.totalorder %v14712_v44, 2 }
  0x76   : > { %12146 = vmatmul.mubr.f32.gmra.mrb[2].mxu0 %v14617_v63 }
  0x77   : > { %12152 = vmatprep.mubr.f32.mxu0 %v14583_v49 }
  0x7a   : > { %12153 = vmatmul.mubr.f32.vlgmr.msra.gmra.mrb[0].mxu0 %v14594_v55 }
  0x7b   : > { %12155 = vmatprep.mubr.f32.mxu0 %v14600_v57 }
  0x7e   : > { %12156 = vmatmul.mubr.f32.gmra.mrb[2].mxu0 %v14617_v63 }
  0x7f   : > { %12310 = vmatprep.mubr.f32.mxu0 %v14497_v30 }
  0x97   : > { %v14750_v60 = vpop.permute.xlu0 %1529 }
  0x98   : > { %16103 = vst [vmem:[#allocation7_spill] sm:$0xff] %v14750_v60  ;;  %v14753_v4 = vpop.permute.xlu1 %1539 }
  0x99   : > { %16104 = vst [vmem:[#allocation8_spill] sm:$0xff] %v14753_v4 }
  0x9b   : > { %v14755_v5 = vpop.permute.xlu0 %1534 }
  0x9c   : > { %16105 = vst [vmem:[#allocation9_spill] sm:$0xff] %v14755_v5  ;;  %v14768_v45 = vpop.permute.xlu1 %1544 }
  0x9d   : > { %16109 = vst [vmem:[#allocation11_spill] sm:$0xff] %v14768_v45 }
 0x14d   : > { %v12154_v11 = vpop.f32.mrb[0].mxu0 }
 0x14e   : > { %v1548_v23 = vadd.f32 %v12154_v11, %v14755_v5  ;;  %v1505_v27 = vpop.f32.mrb[1].mxu0 }
 0x14f   : > { %v1547_v29 = vadd.f32 %v14750_v60, %v1505_v27 }
 0x150   : > { %v14765_v35 = vsel %vm14757_vm12, %v1548_v23, 0.0 }
 0x151   : > { %16108 = vst [vmem:[#allocation10_spill] sm:$0xff] %v14765_v35  ;;  %v1585_v43 = vand.u32 4294901760, %v14765_v35  ;;  %v14772_v46 = vsel %vm14757_vm12, %v1547_v29, 0.0  ;;  %v12157_v47 = vpop.f32.mrb[2].mxu0 }
 0x152   : > { %16110 = vst [vmem:[#allocation12_spill] sm:$0xff] %v14772_v46  ;;  %v1582_v50 = vand.u32 4294901760, %v14772_v46  ;;  %v1550_v51 = vadd.f32 %v12157_v47, %v14768_v45  ;;  %v1517_v52 = vpop.f32.mrb[3].mxu0 }
 0x153   : > { %v1699_v53 = vsub.f32 %v14765_v35, %v1585_v43  ;;  %v1549_v42 = vadd.f32 %v14753_v4, %v1517_v52 }
 0x154   : > { %v14778_v61 = vpack.c.bf16 %v1585_v43, %v1582_v50  ;;  %v1692_v11 = vsub.f32 %v14772_v46, %v1582_v50  ;;  %v14783_v23 = vsel %vm14757_vm12, %v1550_v51, 0.0 }
 0x155   : > { %16111 = vst [vmem:[#allocation13_spill] sm:$0xff] %v14783_v23  ;;  %v1591_v27 = vand.u32 4294901760, %v14783_v23  ;;  %v14788_v29 = vsel %vm14757_vm12, %v1549_v42, 0.0  ;;  %v1700_v47 = vand.u32 4294901760, %v1699_v53 }
 0x156   : > { %v1588_v3 = vand.u32 4294901760, %v14788_v29  ;;  %13299 = vmatprep.subr.bf16.mxu1 %v14778_v61  ;;  %v1693_v52 = vand.u32 4294901760, %v1692_v11 }
 0x157   : > { %v1713_v43 = vsub.f32 %v14783_v23, %v1591_v27  ;;  %13301 = vmatpush3.bf16.msra.mxu1 %v14778_v61  ;;  %v1701_v50 = vsub.f32 %v1699_v53, %v1700_v47 }
 0x158   : > { %v14794_v12 = vpack.c.bf16 %v1591_v27, %v1588_v3  ;;  %v1706_v51 = vsub.f32 %v14788_v29, %v1588_v3  ;;  %v1694_v2 = vsub.f32 %v1692_v11, %v1693_v52 }
 0x159   : > { %v1702_v4 = vand.u32 4294901760, %v1701_v50  ;;  %v1714_v19 = vand.u32 4294901760, %v1713_v43  ;;  %v13314_v50 = vpack.c.bf16 %v1699_v53, %v1692_v11 }
 0x15a   : > { %13303 = vmatprep.subr.bf16.mxu1 %v14794_v12  ;;  %v1695_v42 = vand.u32 4294901760, %v1694_v2  ;;  %v1707_v45 = vand.u32 4294901760, %v1706_v51  ;;  %v13318_v2 = vpack.c.bf16 %v1713_v43, %v1706_v51 }
 0x15b   : > { %13305 = vmatpush3.bf16.msra.mxu1 %v14794_v12  ;;  %v1715_v46 = vsub.f32 %v1713_v43, %v1714_v19  ;;  %v2800_v43 = vsub.s32 2, %v14519_v36 }
 0x15c   : > { %v13306_v35 = vpack.c.bf16 %v1702_v4, %v1695_v42  ;;  %v1708_v60 = vsub.f32 %v1706_v51, %v1707_v45  ;;  %v2304_v4 = vsub.f32 %v14734_v54, %v14734_v54 }
 0x15d   : > { %v1716_v23 = vand.u32 4294901760, %v1715_v46  ;;  %v13334_v46 = vpack.c.bf16 %v1714_v19, %v1707_v45  ;;  %v14889_v51 = vrot.slane %v14534_v38, %v2800_v43  ;;  %v16115_v19 = vmov 0   ;;  %v16125_v43 = vld [vmem:[#allocation12_spill] sm:$0xff] }
 0x15e   : > { %12167 = vmatmul.mubr.f32.vlgmr.msra.gmra.mrb[0].mxu1 %v14499_v31  ;;  %13307 = vmatprep.subr.bf16.mxu1 %v13306_v35  ;;  %v1709_v27 = vand.u32 4294901760, %v1708_v60  ;;  %v13330_v60 = vpack.c.bf16 %v1700_v47, %v1693_v52  ;;  %v2305_v53 = vand.u32 4294901760, %v2304_v4  ;;  %v2809_v42 = vsel %vm2808_vm14, 1, %v16115_v19 }
 0x15f   : > { %13309 = vmatpush3.bf16.msra.mxu1 %v13306_v35  ;;  %12169 = vmatprep.mubr.f32.mxu1 %v14501_v32  ;;  %v2311_v35 = vsub.f32 %v14740_v58, %v14740_v58  ;;  %vm2802_vm15 = vcmp.eq.s32.totalorder %v14519_v36, %v14889_v51  ;;  %vm2803_vm1 = vcmp.eq.s32.totalorder %v14539_v39, %v14889_v51  ;;  %vm5280_vm14 = vcmp.eq.s32.totalorder %v14712_v44, 5 }
 0x160   : > { %v13310_v3 = vpack.c.bf16 %v1716_v23, %v1709_v27  ;;  %v2306_v54 = vsub.f32 %v2304_v4, %v2305_v53  ;;  %v2813_v27 = vrot.slane %v2809_v42, %v14529_v37  ;;  %vm15004_vm6 = vmpackc.low %vm2803_vm1, %vm2802_vm15 }
 0x161   : > { %v2312_v11 = vand.u32 4294901760, %v2311_v35 }
 0x162   : > { %12170 = vmatmul.mubr.f32.gmra.mrb[2].mxu1 %v14512_v34  ;;  %13311 = vmatprep.subr.bf16.mxu1 %v13310_v3  ;;  %v2307_v58 = vand.u32 4294901760, %v2306_v54  ;;  %vm14910_vm2 = vcmp.eq.s32.totalorder %v2813_v27, 1 }
 0x163   : > { %13313 = vmatpush3.bf16.msra.mxu1 %v13310_v3  ;;  %12180 = vmatprep.mubr.f32.mxu1 %v14440_v8  ;;  %v2313_v23 = vsub.f32 %v2311_v35, %v2312_v11  ;;  %v13362_v48 = vpack.c.bf16 %v2312_v11, %v2305_v53  ;;  %v16116_v3 = vmov 0.0  }
 0x164   : > { %13315 = vmatprep.subr.bf16.mxu1 %v13314_v50 }
 0x165   : > { %v2314_v45 = vand.u32 4294901760, %v2313_v23 }
 0x166   : > { %12181 = vmatmul.mubr.f32.vlgmr.msra.gmra.mrb[0].mxu1 %v14442_v9 }
 0x167   : > { %13317 = vmatpush3.bf16.msra.mxu1 %v13314_v50  ;;  %12183 = vmatprep.mubr.f32.mxu1 %v14444_v10  ;;  %v13350_v52 = vpack.c.bf16 %v2314_v45, %v2307_v58  ;;  %v14902_v50 = vsel %vm2802_vm15, 1.0, %v16116_v3  ;;  %v16122_v45 = vld [vmem:[#allocation7_spill] sm:$0xff] }
 0x168   : > { %13319 = vmatprep.subr.bf16.mxu1 %v13318_v2 }
 0x16a   : > { %12184 = vmatmul.mubr.f32.gmra.mrb[2].mxu1 %v14449_v13 }
 0x16b   : > { %13321 = vmatpush3.bf16.msra.mxu1 %v13318_v2  ;;  %12194 = vmatprep.mubr.f32.mxu1 %v14453_v14  ;;  %v14908_v2 = vsel %vm2803_vm1, 1.0, %v16116_v3 }
 0x16c   : > { %13323 = vmatprep.subr.bf16.mxu1 %v14778_v61 }
 0x16e   : > { %12195 = vmatmul.mubr.f32.vlgmr.msra.gmra.mrb[0].mxu1 %v14456_v15 }
 0x16f   : > { %13325 = vmatpush3.bf16.msra.mxu1 %v14778_v61  ;;  %12197 = vmatprep.mubr.f32.mxu1 %v14459_v16 }
 0x170   : > { %13327 = vmatprep.subr.bf16.mxu1 %v14794_v12 }
 0x172   : > { %12198 = vmatmul.mubr.f32.gmra.mrb[2].mxu1 %v14465_v18 }
 0x173   : > { %13329 = vmatpush3.bf16.msra.mxu1 %v14794_v12  ;;  %12208 = vmatprep.mubr.f32.mxu1 %v14471_v20 }
 0x174   : > { %13331 = vmatprep.subr.bf16.mxu1 %v13330_v60 }
 0x176   : > { %12209 = vmatmul.mubr.f32.vlgmr.msra.gmra.mrb[0].mxu1 %v14474_v21 }
 0x177   : > { %13333 = vmatpush3.bf16.msra.mxu1 %v13330_v60  ;;  %12211 = vmatprep.mubr.f32.mxu1 %v14477_v22  ;;  %v16117_v60 = vmov 0 }
 0x178   : > { %13335 = vmatprep.subr.bf16.mxu1 %v13334_v46  ;;  %v16118_v60 = vsel %vm14910_vm2, 4294967295, %v16117_v60 }
 0x179   : > { %16119 = vst [vmem:[#allocation14_spill] sm:$0xff] %v16118_v60 }
 0x17a   : > { %12212 = vmatmul.mubr.f32.gmra.mrb[2].mxu1 %v14483_v24 }
 0x17b   : > { %13337 = vmatpush3.bf16.msra.mxu1 %v13334_v46  ;;  %12222 = vmatprep.mubr.f32.mxu1 %v14440_v8  ;;  %v2788_v46 = vsel %vm2787_vm4, 1, %v16115_v19  ;;  %vm5259_vm4 = vcmp.gt.s32.totalorder %v14712_v44, 4 }
 0x17c   : > { %13339 = vmatprep.subr.bf16.mxu1 %v14778_v61  ;;  %v2792_v53 = vrot.slane %v2788_v46, %v14529_v37 }
 0x17e   : > { %12223 = vmatmul.mubr.f32.vlgmr.msra.gmra.mrb[0].mxu1 %v14442_v9  ;;  %vm14925_vm5 = vcmp.eq.s32.totalorder %v2792_v53, 1  ;;  %v16127_v53 = vld [vmem:[#allocation11_spill] sm:$0xff] }
 0x17f   : > { %13341 = vmatpush3.bf16.msra.mxu1 %v14778_v61  ;;  %12225 = vmatprep.mubr.f32.mxu1 %v14444_v10  ;;  %v16114_v61 = vmov 1.0|1.0  }
 0x180   : > { %13343 = vmatprep.subr.bf16.mxu1 %v14794_v12 }
 0x182   : > { %12226 = vmatmul.mubr.f32.gmra.mrb[2].mxu1 %v14449_v13 }
 0x183   : > { %13345 = vmatpush3.bf16.msra.mxu1 %v14794_v12  ;;  %12236 = vmatprep.mubr.f32.mxu1 %v14440_v8  ;;  %v13354_v12 = vpack.c.bf16 %v2311_v35, %v2304_v4  ;;  %v16128_v4 = vld [vmem:[#allocation8_spill] sm:$0xff] }
 0x184   : > { %13347 = vmatprep.subr.msk.bf16.mxu1 %vm14834_vm13, %v16114_v61 }
 0x186   : > { %12237 = vmatmul.mubr.f32.vlgmr.msra.gmra.mrb[0].mxu1 %v14442_v9 }
 0x187   : > { %13349 = vmatpush3.bf16.msk.msra.mxu1 %vm14834_vm13, %v16114_v61  ;;  %12239 = vmatprep.mubr.f32.mxu1 %v14444_v10 }
 0x188   : > { %13351 = vmatprep.subr.bf16.mxu1 %v13350_v52 }
 0x18a   : > { %12240 = vmatmul.mubr.f32.gmra.mrb[2].mxu1 %v14449_v13 }
 0x18b   : > { %12246 = vmatprep.mubr.f32.mxu1 %v14653_v26 }
 0x18e   : > { %12247 = vmatmul.mubr.f32.vlgmr.msra.gmra.mrb[0].mxu1 %v14658_v28 }
 0x18f   : > { %13353 = vmatpush3.bf16.msra.mxu1 %v13350_v52  ;;  %12249 = vmatprep.mubr.f32.mxu1 %v14663_v33  ;;  %v16123_v52 = vld [vmem:[#allocation10_spill] sm:$0xff] }
 0x190   : > { %13355 = vmatprep.subr.bf16.mxu1 %v13354_v12 }
 0x192   : > { %12250 = vmatmul.mubr.f32.gmra.mrb[2].mxu1 %v14668_v40 }
 0x193   : > { %12256 = vmatprep.mubr.f32.mxu1 %v14583_v49 }
 0x196   : > { %12257 = vmatmul.mubr.f32.vlgmr.msra.gmra.mrb[0].mxu1 %v14594_v55 }
 0x197   : > { %13357 = vmatpush3.bf16.msra.mxu1 %v13354_v12  ;;  %12259 = vmatprep.mubr.f32.mxu1 %v14600_v57 }
 0x198   : > { %13359 = vmatprep.subr.msk.bf16.mxu1 %vm14834_vm13, %v16114_v61 }
 0x19a   : > { %12260 = vmatmul.mubr.f32.gmra.mrb[2].mxu1 %v14617_v63 }
 0x19b   : > { %12266 = vmatprep.mubr.f32.mxu1 %v14598_v56 }
 0x19e   : > { %12267 = vmatmul.mubr.f32.vlgmr.msra.gmra.mrb[0].mxu1 %v14615_v62 }
 0x19f   : > { %13361 = vmatpush3.bf16.msk.msra.mxu1 %vm14834_vm13, %v16114_v61  ;;  %12269 = vmatprep.mubr.f32.mxu1 %v14625_v1 }
 0x1a0   : > { %13363 = vmatprep.subr.bf16.mxu1 %v13362_v48 }
 0x1a2   : > { %12270 = vmatmul.mubr.f32.gmra.mrb[2].mxu1 %v14635_v7 }
 0x1a3   : > { %12276 = vmatprep.mubr.f32.mxu1 %v14622_v0 }
 0x1a6   : > { %12277 = vmatmul.mubr.f32.vlgmr.msra.gmra.mrb[0].mxu1 %v14632_v6 }
 0x1a7   : > { %13365 = vmatpush3.bf16.msra.mxu1 %v13362_v48  ;;  %12279 = vmatprep.mubr.f32.mxu1 %v14641_v17 }
 0x1a8   : > { %13367 = vmatprep.subr.msk.bf16.mxu1 %vm14834_vm13, %v16114_v61 }
 0x1aa   : > { %12280 = vmatmul.mubr.f32.gmra.mrb[2].mxu1 %v14647_v25 }
 0x1ab   : > { %12286 = vmatprep.mubr.f32.mxu1 %v14583_v49 }
 0x1ae   : > { %12287 = vmatmul.mubr.f32.vlgmr.msra.gmra.mrb[0].mxu1 %v14594_v55 }
 0x1af   : > { %13369 = vmatpush3.bf16.msk.msra.mxu1 %vm14834_vm13, %v16114_v61  ;;  %12289 = vmatprep.mubr.f32.mxu1 %v14600_v57 }
 0x1b2   : > { %12290 = vmatmul.mubr.f32.gmra.mrb[2].mxu1 %v14617_v63 }
 0x1b3   : > { %12296 = vmatprep.mubr.f32.mxu1 %v14583_v49 }
 0x1b6   : > { %12297 = vmatmul.mubr.f32.vlgmr.msra.gmra.mrb[0].mxu1 %v14594_v55 }
 0x1b7   : > { %12299 = vmatprep.mubr.f32.mxu1 %v14600_v57 }
 0x1ba   : > { %12300 = vmatmul.mubr.f32.gmra.mrb[2].mxu1 %v14617_v63 }
 0x1bb   : > { %12454 = vmatprep.mubr.f32.mxu1 %v14497_v30 }
 0x289   : > { %v12298_v11 = vpop.f32.mrb[0].mxu1 }
 0x28a   : > { %v2784_v23 = vadd.f32 %v12298_v11, %v14755_v5  ;;  %v2761_v58 = vpop.f32.mrb[1].mxu1 }
 0x28b   : > { %v2783_v47 = vadd.f32 %v2761_v58, %v16122_v45 }
 0x28c   : > { %v14934_v12 = vsel %vm14925_vm5, %v2784_v23, %v16123_v52  ;;  %v16129_v52 = vld [vmem:[#allocation13_spill] sm:$0xff] }
 0x28d   : > { %16124 = vst [vmem:[#allocation10_spill] sm:$0xff] %v14934_v12  ;;  %v2821_v48 = vand.u32 4294901760, %v14934_v12  ;;  %v14940_v42 = vsel %vm14925_vm5, %v2783_v47, %v16125_v43  ;;  %v12301_v27 = vpop.f32.mrb[2].mxu1 }
 0x28e   : > { %16126 = vst [vmem:[#allocation12_spill] sm:$0xff] %v14940_v42  ;;  %v2818_v46 = vand.u32 4294901760, %v14940_v42  ;;  %v2786_v11 = vadd.f32 %v12301_v27, %v16127_v53  ;;  %v2773_v35 = vpop.f32.mrb[3].mxu1 }
 0x28f   : > { %v2935_v58 = vsub.f32 %v14934_v12, %v2821_v48  ;;  %v2785_v45 = vadd.f32 %v2773_v35, %v16128_v4 }
 0x290   : > { %v14946_v5 = vpack.c.bf16 %v2821_v48, %v2818_v46  ;;  %v2928_v23 = vsub.f32 %v14940_v42, %v2818_v46  ;;  %v14952_v41 = vsel %vm14925_vm5, %v2786_v11, %v16129_v52 }
 0x291   : > { %16130 = vst [vmem:[#allocation13_spill] sm:$0xff] %v14952_v41  ;;  %v2827_v47 = vand.u32 4294901760, %v14952_v41  ;;  %v14958_v43 = vsel %vm14925_vm5, %v2785_v45, %v14788_v29  ;;  %v2936_v27 = vand.u32 4294901760, %v2935_v58 }
 0x292   : > { %v2824_v53 = vand.u32 4294901760, %v14958_v43  ;;  %13371 = vmatprep.subr.bf16.mxu0 %v14946_v5  ;;  %v2929_v35 = vand.u32 4294901760, %v2928_v23 }
 0x293   : > { %v2949_v48 = vsub.f32 %v14952_v41, %v2827_v47  ;;  %13373 = vmatpush3.bf16.msra.mxu0 %v14946_v5  ;;  %v2937_v46 = vsub.f32 %v2935_v58, %v2936_v27 }
 0x294   : > { %v14964_v11 = vpack.c.bf16 %v2827_v47, %v2824_v53  ;;  %v2942_v52 = vsub.f32 %v14958_v43, %v2824_v53  ;;  %v2930_v4 = vsub.f32 %v2928_v23, %v2929_v35 }
 0x295   : > { %v2938_v42 = vand.u32 4294901760, %v2937_v46  ;;  %v2950_v54 = vand.u32 4294901760, %v2949_v48  ;;  %v13386_v46 = vpack.c.bf16 %v2935_v58, %v2928_v23 }
 0x296   : > { %13375 = vmatprep.subr.bf16.mxu0 %v14964_v11  ;;  %v2931_v29 = vand.u32 4294901760, %v2930_v4  ;;  %v2943_v45 = vand.u32 4294901760, %v2942_v52  ;;  %v13390_v4 = vpack.c.bf16 %v2949_v48, %v2942_v52 }
 0x297   : > { %13377 = vmatpush3.bf16.msra.mxu0 %v14964_v11  ;;  %v2951_v12 = vsub.f32 %v2949_v48, %v2950_v54 }
 0x298   : > { %v13378_v59 = vpack.c.bf16 %v2938_v42, %v2931_v29  ;;  %v2944_v60 = vsub.f32 %v2942_v52, %v2943_v45 }
 0x299   : > { %v2952_v41 = vand.u32 4294901760, %v2951_v12  ;;  %v13406_v12 = vpack.c.bf16 %v2950_v54, %v2943_v45  ;;  %v4036_v54 = vsub.s32 3, %v14519_v36  ;;  %v4045_v45 = vsel %vm4044_vm7, 1, %v16115_v19 }
 0x29a   : > { %12311 = vmatmul.mubr.f32.vlgmr.msra.gmra.mrb[4].mxu0 %v14499_v31  ;;  %13379 = vmatprep.subr.bf16.mxu0 %v13378_v59  ;;  %v2945_v47 = vand.u32 4294901760, %v2944_v60  ;;  %v3547_v60 = vsub.f32 %v14908_v2, %v14908_v2 }
 0x29b   : > { %13381 = vmatpush3.bf16.msra.mxu0 %v13378_v59  ;;  %12313 = vmatprep.mubr.f32.mxu0 %v14501_v32  ;;  %v13402_v59 = vpack.c.bf16 %v2936_v27, %v2929_v35  ;;  %v15059_v29 = vrot.slane %v14534_v38, %v4036_v54 }
 0x29c   : > { %v13382_v53 = vpack.c.bf16 %v2952_v41, %v2945_v47  ;;  %v3540_v41 = vsub.f32 %v14902_v50, %v14902_v50  ;;  %v3548_v58 = vand.u32 4294901760, %v3547_v60  ;;  %v4049_v47 = vrot.slane %v4045_v45, %v14529_v37  ;;  %v16146_v45 = vld [vmem:[#allocation12_spill] sm:$0xff] }
 0x29d   : > { %vm4038_vm8 = vcmp.eq.s32.totalorder %v14519_v36, %v15059_v29  ;;  %vm4039_vm9 = vcmp.eq.s32.totalorder %v14539_v39, %v15059_v29 }
 0x29e   : > { %12314 = vmatmul.mubr.f32.gmra.mrb[6].mxu0 %v14512_v34  ;;  %13383 = vmatprep.subr.bf16.mxu0 %v13382_v53  ;;  %v3541_v42 = vand.u32 4294901760, %v3540_v41  ;;  %v3549_v27 = vsub.f32 %v3547_v60, %v3548_v58  ;;  %v13426_v51 = vpack.c.bf16 %v3547_v60, %v3540_v41  ;;  %v15078_v38 = vsel %vm4039_vm9, 1.0, %v16116_v3  ;;  %v16137_v60 = vld [vmem:[#allocation6_spill] sm:$0xff]  ;;  %vm15178_vm13 = vmpackc.low %vm4039_vm9, %vm4038_vm8 }
 0x29f   : > { %13385 = vmatpush3.bf16.msra.mxu0 %v13382_v53  ;;  %12324 = vmatprep.mubr.f32.mxu0 %v14440_v8  ;;  %v15072_v53 = vsel %vm4038_vm8, 1.0, %v16116_v3  ;;  %vm4050_vm10 = vcmp.eq.s32.totalorder %v4049_v47, 1 }
 0x2a0   : > { %13387 = vmatprep.subr.bf16.mxu0 %v13386_v46  ;;  %v3542_v23 = vsub.f32 %v3540_v41, %v3541_v42  ;;  %v3550_v48 = vand.u32 4294901760, %v3549_v27 }
 0x2a2   : > { %12325 = vmatmul.mubr.f32.vlgmr.msra.gmra.mrb[4].mxu0 %v14442_v9  ;;  %v3543_v35 = vand.u32 4294901760, %v3542_v23 }
 0x2a3   : > { %13389 = vmatpush3.bf16.msra.mxu0 %v13386_v46  ;;  %12327 = vmatprep.mubr.f32.mxu0 %v14444_v10 }
 0x2a4   : > { %13391 = vmatprep.subr.bf16.mxu0 %v13390_v4 }
 0x2a6   : > { %12328 = vmatmul.mubr.f32.gmra.mrb[6].mxu0 %v14449_v13 }
 0x2a7   : > { %13393 = vmatpush3.bf16.msra.mxu0 %v13390_v4  ;;  %12338 = vmatprep.mubr.f32.mxu0 %v14453_v14  ;;  %v16134_v4 = vld [vmem:[#allocation5_spill] sm:$0xff] }
 0x2a8   : > { %13395 = vmatprep.subr.bf16.mxu0 %v14946_v5 }
 0x2aa   : > { %12339 = vmatmul.mubr.f32.vlgmr.msra.gmra.mrb[4].mxu0 %v14456_v15 }
 0x2ab   : > { %13397 = vmatpush3.bf16.msra.mxu0 %v14946_v5  ;;  %12341 = vmatprep.mubr.f32.mxu0 %v14459_v16 }
 0x2ac   : > { %13399 = vmatprep.subr.bf16.mxu0 %v14964_v11 }
 0x2ae   : > { %12342 = vmatmul.mubr.f32.gmra.mrb[6].mxu0 %v14465_v18 }
 0x2af   : > { %13401 = vmatpush3.bf16.msra.mxu0 %v14964_v11  ;;  %12352 = vmatprep.mubr.f32.mxu0 %v14471_v20 }
 0x2b0   : > { %13403 = vmatprep.subr.bf16.mxu0 %v13402_v59 }
 0x2b2   : > { %12353 = vmatmul.mubr.f32.vlgmr.msra.gmra.mrb[4].mxu0 %v14474_v21 }
 0x2b3   : > { %13405 = vmatpush3.bf16.msra.mxu0 %v13402_v59  ;;  %12355 = vmatprep.mubr.f32.mxu0 %v14477_v22  ;;  %v16135_v59 = vsel %vm14910_vm2, %v14902_v50, %v16134_v4 }
 0x2b4   : > { %13407 = vmatprep.subr.bf16.mxu0 %v13406_v12  ;;  %v15086_v41 = vsel %vm4050_vm10, %v15072_v53, %v16135_v59  ;;  %v16148_v59 = vld [vmem:[#allocation11_spill] sm:$0xff] }
 0x2b5   : > { %16136 = vst [vmem:[#allocation14_spill] sm:$0xff] %v15086_v41 }
 0x2b6   : > { %12356 = vmatmul.mubr.f32.gmra.mrb[6].mxu0 %v14483_v24 }
 0x2b7   : > { %13409 = vmatpush3.bf16.msra.mxu0 %v13406_v12  ;;  %12366 = vmatprep.mubr.f32.mxu0 %v14440_v8  ;;  %v16138_v12 = vsel %vm14910_vm2, %v14908_v2, %v16137_v60  ;;  %v16144_v2 = vld [vmem:[#allocation10_spill] sm:$0xff] }
 0x2b8   : > { %13411 = vmatprep.subr.bf16.mxu0 %v14946_v5 }
 0x2ba   : > { %12367 = vmatmul.mubr.f32.vlgmr.msra.gmra.mrb[4].mxu0 %v14442_v9 }
 0x2bb   : > { %13413 = vmatpush3.bf16.msra.mxu0 %v14946_v5  ;;  %12369 = vmatprep.mubr.f32.mxu0 %v14444_v10  ;;  %v13422_v5 = vpack.c.bf16 %v3550_v48, %v3543_v35  ;;  %v16142_v35 = vld [vmem:[#allocation9_spill] sm:$0xff] }
 0x2bc   : > { %13415 = vmatprep.subr.bf16.mxu0 %v14964_v11 }
 0x2be   : > { %12370 = vmatmul.mubr.f32.gmra.mrb[6].mxu0 %v14449_v13 }
 0x2bf   : > { %13417 = vmatpush3.bf16.msra.mxu0 %v14964_v11  ;;  %12380 = vmatprep.mubr.f32.mxu0 %v14440_v8  ;;  %v13434_v11 = vpack.c.bf16 %v3548_v58, %v3541_v42  ;;  %v15094_v42 = vsel %vm4050_vm10, %v15078_v38, %v16138_v12  ;;  %v4024_v58 = vsel %vm4023_vm11, 1, %v16115_v19 }
 0x2c0   : > { %13419 = vmatprep.subr.msk.bf16.mxu0 %vm15004_vm6, %v16114_v61  ;;  %16139 = vst [vmem:[#allocation5_spill] sm:$0xff] %v15094_v42  ;;  %v4028_v23 = vrot.slane %v4024_v58, %v14529_v37 }
 0x2c2   : > { %12381 = vmatmul.mubr.f32.vlgmr.msra.gmra.mrb[4].mxu0 %v14442_v9  ;;  %vm15099_vm12 = vcmp.eq.s32.totalorder %v4028_v23, 1  ;;  %v16149_v23 = vld [vmem:[#allocation8_spill] sm:$0xff] }
 0x2c3   : > { %13421 = vmatpush3.bf16.msk.msra.mxu0 %vm15004_vm6, %v16114_v61  ;;  %12383 = vmatprep.mubr.f32.mxu0 %v14444_v10 }
 0x2c4   : > { %13423 = vmatprep.subr.bf16.mxu0 %v13422_v5 }
 0x2c6   : > { %12384 = vmatmul.mubr.f32.gmra.mrb[6].mxu0 %v14449_v13 }
 0x2c7   : > { %12390 = vmatprep.mubr.f32.mxu0 %v14653_v26 }
 0x2ca   : > { %12391 = vmatmul.mubr.f32.vlgmr.msra.gmra.mrb[4].mxu0 %v14658_v28 }
 0x2cb   : > { %13425 = vmatpush3.bf16.msra.mxu0 %v13422_v5  ;;  %12393 = vmatprep.mubr.f32.mxu0 %v14663_v33  ;;  %v16143_v5 = vld [vmem:[#allocation7_spill] sm:$0xff] }
 0x2cc   : > { %13427 = vmatprep.subr.bf16.mxu0 %v13426_v51 }
 0x2ce   : > { %12394 = vmatmul.mubr.f32.gmra.mrb[6].mxu0 %v14668_v40 }
 0x2cf   : > { %12400 = vmatprep.mubr.f32.mxu0 %v14583_v49 }
 0x2d2   : > { %12401 = vmatmul.mubr.f32.vlgmr.msra.gmra.mrb[4].mxu0 %v14594_v55 }
 0x2d3   : > { %13429 = vmatpush3.bf16.msra.mxu0 %v13426_v51  ;;  %12403 = vmatprep.mubr.f32.mxu0 %v14600_v57 }
 0x2d4   : > { %13431 = vmatprep.subr.msk.bf16.mxu0 %vm15004_vm6, %v16114_v61 }
 0x2d6   : > { %12404 = vmatmul.mubr.f32.gmra.mrb[6].mxu0 %v14617_v63 }
 0x2d7   : > { %12410 = vmatprep.mubr.f32.mxu0 %v14598_v56 }
 0x2da   : > { %12411 = vmatmul.mubr.f32.vlgmr.msra.gmra.mrb[4].mxu0 %v14615_v62 }
 0x2db   : > { %13433 = vmatpush3.bf16.msk.msra.mxu0 %vm15004_vm6, %v16114_v61  ;;  %12413 = vmatprep.mubr.f32.mxu0 %v14625_v1 }
 0x2dc   : > { %13435 = vmatprep.subr.bf16.mxu0 %v13434_v11 }
 0x2de   : > { %12414 = vmatmul.mubr.f32.gmra.mrb[6].mxu0 %v14635_v7 }
 0x2df   : > { %12420 = vmatprep.mubr.f32.mxu0 %v14622_v0 }
 0x2e2   : > { %12421 = vmatmul.mubr.f32.vlgmr.msra.gmra.mrb[4].mxu0 %v14632_v6 }
 0x2e3   : > { %13437 = vmatpush3.bf16.msra.mxu0 %v13434_v11  ;;  %12423 = vmatprep.mubr.f32.mxu0 %v14641_v17 }
 0x2e4   : > { %13439 = vmatprep.subr.msk.bf16.mxu0 %vm15004_vm6, %v16114_v61 }
 0x2e6   : > { %12424 = vmatmul.mubr.f32.gmra.mrb[6].mxu0 %v14647_v25 }
 0x2e7   : > { %12430 = vmatprep.mubr.f32.mxu0 %v14583_v49 }
 0x2ea   : > { %12431 = vmatmul.mubr.f32.vlgmr.msra.gmra.mrb[4].mxu0 %v14594_v55 }
 0x2eb   : > { %13441 = vmatpush3.bf16.msk.msra.mxu0 %vm15004_vm6, %v16114_v61  ;;  %12433 = vmatprep.mubr.f32.mxu0 %v14600_v57 }
 0x2ee   : > { %12434 = vmatmul.mubr.f32.gmra.mrb[6].mxu0 %v14617_v63 }
 0x2ef   : > { %12440 = vmatprep.mubr.f32.mxu0 %v14583_v49 }
 0x2f2   : > { %12441 = vmatmul.mubr.f32.vlgmr.msra.gmra.mrb[4].mxu0 %v14594_v55 }
 0x2f3   : > { %12443 = vmatprep.mubr.f32.mxu0 %v14600_v57 }
 0x2f6   : > { %12444 = vmatmul.mubr.f32.gmra.mrb[6].mxu0 %v14617_v63 }
 0x2f7   : > { %12598 = vmatprep.mubr.f32.mxu0 %v14497_v30 }
 0x3c5   : > { %v12442_v27 = vpop.f32.mrb[4].mxu0 }
 0x3c6   : > { %v4020_v48 = vadd.f32 %v12442_v27, %v16142_v35  ;;  %v3997_v52 = vpop.f32.mrb[5].mxu0 }
 0x3c7   : > { %v4019_v51 = vadd.f32 %v3997_v52, %v16143_v5 }
 0x3c8   : > { %v15108_v11 = vsel %vm15099_vm12, %v4020_v48, %v16144_v2  ;;  %v16150_v2 = vld [vmem:[#allocation13_spill] sm:$0xff] }
 0x3c9   : > { %16145 = vst [vmem:[#allocation6_spill] sm:$0xff] %v15108_v11  ;;  %v4057_v54 = vand.u32 4294901760, %v15108_v11  ;;  %v15114_v47 = vsel %vm15099_vm12, %v4019_v51, %v16146_v45  ;;  %v12445_v46 = vpop.f32.mrb[6].mxu0 }
 0x3ca   : > { %16147 = vst [vmem:[#allocation10_spill] sm:$0xff] %v15114_v47  ;;  %v4054_v4 = vand.u32 4294901760, %v15114_v47  ;;  %v4022_v60 = vadd.f32 %v12445_v46, %v16148_v59  ;;  %v4009_v12 = vpop.f32.mrb[7].mxu0 }
 0x3cb   : > { %v4171_v58 = vsub.f32 %v15108_v11, %v4057_v54  ;;  %v4021_v27 = vadd.f32 %v4009_v12, %v16149_v23 }
 0x3cc   : > { %v15120_v52 = vpack.c.bf16 %v4057_v54, %v4054_v4  ;;  %v4164_v48 = vsub.f32 %v15114_v47, %v4054_v4  ;;  %v15126_v5 = vsel %vm15099_vm12, %v4022_v60, %v16150_v2 }
 0x3cd   : > { %16151 = vst [vmem:[#allocation12_spill] sm:$0xff] %v15126_v5  ;;  %v4063_v51 = vand.u32 4294901760, %v15126_v5  ;;  %v15132_v45 = vsel %vm15099_vm12, %v4021_v27, %v14958_v43  ;;  %v4172_v46 = vand.u32 4294901760, %v4171_v58 }
 0x3ce   : > { %v4060_v59 = vand.u32 4294901760, %v15132_v45  ;;  %13443 = vmatprep.subr.bf16.mxu1 %v15120_v52  ;;  %v4165_v54 = vand.u32 4294901760, %v4164_v48 }
 0x3cf   : > { %v4185_v4 = vsub.f32 %v15126_v5, %v4063_v51  ;;  %13445 = vmatpush3.bf16.msra.mxu1 %v15120_v52  ;;  %v4173_v12 = vsub.f32 %v4171_v58, %v4172_v46 }
 0x3d0   : > { %v15138_v60 = vpack.c.bf16 %v4063_v51, %v4060_v59  ;;  %v4178_v2 = vsub.f32 %v15132_v45, %v4060_v59  ;;  %v4166_v23 = vsub.f32 %v4164_v48, %v4165_v54 }
 0x3d1   : > { %v4174_v47 = vand.u32 4294901760, %v4173_v12  ;;  %v4186_v50 = vand.u32 4294901760, %v4185_v4  ;;  %v13458_v12 = vpack.c.bf16 %v4171_v58, %v4164_v48 }
 0x3d2   : > { %13447 = vmatprep.subr.bf16.mxu1 %v15138_v60  ;;  %v4167_v43 = vand.u32 4294901760, %v4166_v23  ;;  %v4179_v27 = vand.u32 4294901760, %v4178_v2 }
 0x3d3   : > { %13449 = vmatpush3.bf16.msra.mxu1 %v15138_v60  ;;  %v4187_v11 = vsub.f32 %v4185_v4, %v4186_v50 }
 0x3d4   : > { %v13450_v35 = vpack.c.bf16 %v4174_v47, %v4167_v43  ;;  %v4180_v42 = vsub.f32 %v4178_v2, %v4179_v27  ;;  %v13462_v47 = vpack.c.bf16 %v4185_v4, %v4178_v2  ;;  %v15233_v2 = vld [vmem:[%s14525_s26] sm:$0xff]  ;;  %v5281_v43 = vsel %vm5280_vm14, 1, %v16115_v19  ;;  %s14264_s26 = sshll.u32 %s14329_s9, 4  ;;  %s14265_s26 = int_to_ptr.vmem [resolvable:$false] %s14264_s26 }
 0x3d5   : > { %v4188_v5 = vand.u32 4294901760, %v4187_v11  ;;  %v13478_v11 = vpack.c.bf16 %v4186_v50, %v4179_v27  ;;  %16154 = vst [vmem:[#allocation13_spill] sm:$0xff] %v15233_v2  ;;  %v5285_v27 = vrot.slane %v5281_v43, %v14529_v37  ;;  %s14266_s10 = scalar_lea.vmem %s14265_s26, 256  ;;  %p14267_p0 = scmp.lt.s32.totalorder %s16004_s20, %s14265_s26 }
 0x3d6   : > { %12455 = vmatmul.mubr.f32.vlgmr.msra.gmra.mrb[4].mxu1 %v14499_v31  ;;  %13451 = vmatprep.subr.bf16.mxu1 %v13450_v35  ;;  %v4181_v51 = vand.u32 4294901760, %v4180_v42  ;;  %v13474_v42 = vpack.c.bf16 %v4172_v46, %v4165_v54  ;;  %p14268_p1 = scmp.lt.s32.totalorder %s14266_s10, %s14260_s22 }
 0x3d7   : > { %13453 = vmatpush3.bf16.msra.mxu1 %v13450_v35  ;;  %12457 = vmatprep.mubr.f32.mxu1 %v14501_v32  ;;  %v4776_v35 = vsub.f32 %v15072_v53, %v15072_v53  ;;  %vm15257_vm2 = vcmp.eq.s32.totalorder %v5285_v27, 1 }
 0x3d8   : > { %v13454_v59 = vpack.c.bf16 %v4188_v5, %v4181_v51  ;;  %v4783_v5 = vsub.f32 %v15078_v38, %v15078_v38  ;;  %p14269_p2 = por %p14268_p1, %p14267_p0 }
 0x3d9   : > { %v4777_v58 = vand.u32 4294901760, %v4776_v35 }
 0x3da   : > { %12458 = vmatmul.mubr.f32.gmra.mrb[6].mxu1 %v14512_v34  ;;  %13455 = vmatprep.subr.bf16.mxu1 %v13454_v59  ;;  %v4784_v23 = vand.u32 4294901760, %v4783_v5  ;;  %v13498_v29 = vpack.c.bf16 %v4783_v5, %v4776_v35  ;;  %p14270_p3 = pnand %p14269_p2, %p14263_p13 }
 0x3db   : > { %13457 = vmatpush3.bf16.msra.mxu1 %v13454_v59  ;;  %12468 = vmatprep.mubr.f32.mxu1 %v14440_v8  ;;  %v4778_v53 = vsub.f32 %v4776_v35, %v4777_v58  ;;  %v16167_v35 = vld [vmem:[#allocation8_spill] sm:$0xff] }
 0x3dc   : > { %13459 = vmatprep.subr.bf16.mxu1 %v13458_v12  ;;  %v4785_v48 = vsub.f32 %v4783_v5, %v4784_v23  ;;  %v13506_v4 = vpack.c.bf16 %v4784_v23, %v4777_v58  ;;  %v5260_v5 = vsel %vm5259_vm4, 1, %v16115_v19 }
 0x3dd   : > { %v4779_v38 = vand.u32 4294901760, %v4778_v53  ;;  %v16160_v53 = vld [vmem:[#allocation9_spill] sm:$0xff] }
 0x3de   : > { %12469 = vmatmul.mubr.f32.vlgmr.msra.gmra.mrb[4].mxu1 %v14442_v9  ;;  %v4786_v46 = vand.u32 4294901760, %v4785_v48 }
 0x3df   : > { %13461 = vmatpush3.bf16.msra.mxu1 %v13458_v12  ;;  %12471 = vmatprep.mubr.f32.mxu1 %v14444_v10 }
 0x3e0   : > { %13463 = vmatprep.subr.bf16.mxu1 %v13462_v47 }
 0x3e2   : > { %12472 = vmatmul.mubr.f32.gmra.mrb[6].mxu1 %v14449_v13 }
 0x3e3   : > { %13465 = vmatpush3.bf16.msra.mxu1 %v13462_v47  ;;  %12482 = vmatprep.mubr.f32.mxu1 %v14453_v14 }
 0x3e4   : > { %13467 = vmatprep.subr.bf16.mxu1 %v15120_v52 }
 0x3e6   : > { %12483 = vmatmul.mubr.f32.vlgmr.msra.gmra.mrb[4].mxu1 %v14456_v15 }
 0x3e7   : > { %13469 = vmatpush3.bf16.msra.mxu1 %v15120_v52  ;;  %12485 = vmatprep.mubr.f32.mxu1 %v14459_v16 }
 0x3e8   : > { %13471 = vmatprep.subr.bf16.mxu1 %v15138_v60 }
 0x3ea   : > { %12486 = vmatmul.mubr.f32.gmra.mrb[6].mxu1 %v14465_v18 }
 0x3eb   : > { %13473 = vmatpush3.bf16.msra.mxu1 %v15138_v60  ;;  %12496 = vmatprep.mubr.f32.mxu1 %v14471_v20 }
 0x3ec   : > { %13475 = vmatprep.subr.bf16.mxu1 %v13474_v42 }
 0x3ee   : > { %12497 = vmatmul.mubr.f32.vlgmr.msra.gmra.mrb[4].mxu1 %v14474_v21 }
 0x3ef   : > { %13477 = vmatpush3.bf16.msra.mxu1 %v13474_v42  ;;  %12499 = vmatprep.mubr.f32.mxu1 %v14477_v22 }
 0x3f0   : > { %13479 = vmatprep.subr.bf16.mxu1 %v13478_v11 }
 0x3f2   : > { %12500 = vmatmul.mubr.f32.gmra.mrb[6].mxu1 %v14483_v24 }
 0x3f3   : > { %13481 = vmatpush3.bf16.msra.mxu1 %v13478_v11  ;;  %12510 = vmatprep.mubr.f32.mxu1 %v14440_v8  ;;  %v5264_v11 = vrot.slane %v5260_v5, %v14529_v37  ;;  %v16166_v5 = vld [vmem:[#allocation11_spill] sm:$0xff] }
 0x3f4   : > { %13483 = vmatprep.subr.bf16.mxu1 %v15120_v52 }
 0x3f5   : > { %vm15272_vm5 = vcmp.eq.s32.totalorder %v5264_v11, 1 }
 0x3f6   : > { %12511 = vmatmul.mubr.f32.vlgmr.msra.gmra.mrb[4].mxu1 %v14442_v9 }
 0x3f7   : > { %13485 = vmatpush3.bf16.msra.mxu1 %v15120_v52  ;;  %12513 = vmatprep.mubr.f32.mxu1 %v14444_v10  ;;  %v13494_v52 = vpack.c.bf16 %v4786_v46, %v4779_v38  ;;  %v16161_v46 = vld [vmem:[#allocation7_spill] sm:$0xff] }
 0x3f8   : > { %13487 = vmatprep.subr.bf16.mxu1 %v15138_v60 }
 0x3fa   : > { %12514 = vmatmul.mubr.f32.gmra.mrb[6].mxu1 %v14449_v13 }
 0x3fb   : > { %13489 = vmatpush3.bf16.msra.mxu1 %v15138_v60  ;;  %12524 = vmatprep.mubr.f32.mxu1 %v14440_v8  ;;  %v5272_v60 = vsub.s32 4, %v14519_v36 }
 0x3fc   : > { %13491 = vmatprep.subr.msk.bf16.mxu1 %vm15178_vm13, %v16114_v61 }
 0x3fd   : > { %v15236_v50 = vrot.slane %v15233_v2, %v5272_v60 }
 0x3fe   : > { %12525 = vmatmul.mubr.f32.vlgmr.msra.gmra.mrb[4].mxu1 %v14442_v9 }
 0x3ff   : > { %13493 = vmatpush3.bf16.msk.msra.mxu1 %vm15178_vm13, %v16114_v61  ;;  %12527 = vmatprep.mubr.f32.mxu1 %v14444_v10  ;;  %vm5274_vm15 = vcmp.eq.s32.totalorder %v14519_v36, %v15236_v50  ;;  %vm5275_vm1 = vcmp.eq.s32.totalorder %v14539_v39, %v15236_v50 }
 0x400   : > { %13495 = vmatprep.subr.bf16.mxu1 %v13494_v52  ;;  %v15249_v51 = vsel %vm5274_vm15, 1.0, %v16116_v3  ;;  %v15255_v59 = vsel %vm5275_vm1, 1.0, %v16116_v3  ;;  %vm15351_vm6 = vmpackc.low %vm5275_vm1, %vm5274_vm15 }
 0x402   : > { %12528 = vmatmul.mubr.f32.gmra.mrb[6].mxu1 %v14449_v13 }
 0x403   : > { %12534 = vmatprep.mubr.f32.mxu1 %v14653_v26 }
 0x406   : > { %12535 = vmatmul.mubr.f32.vlgmr.msra.gmra.mrb[4].mxu1 %v14658_v28 }
 0x407   : > { %13497 = vmatpush3.bf16.msra.mxu1 %v13494_v52  ;;  %12537 = vmatprep.mubr.f32.mxu1 %v14663_v33  ;;  %v16162_v52 = vld [vmem:[#allocation6_spill] sm:$0xff] }
 0x408   : > { %13499 = vmatprep.subr.bf16.mxu1 %v13498_v29 }
 0x40a   : > { %12538 = vmatmul.mubr.f32.gmra.mrb[6].mxu1 %v14668_v40 }
 0x40b   : > { %12544 = vmatprep.mubr.f32.mxu1 %v14583_v49 }
 0x40e   : > { %12545 = vmatmul.mubr.f32.vlgmr.msra.gmra.mrb[4].mxu1 %v14594_v55 }
 0x40f   : > { %13501 = vmatpush3.bf16.msra.mxu1 %v13498_v29  ;;  %12547 = vmatprep.mubr.f32.mxu1 %v14600_v57 }
 0x410   : > { %13503 = vmatprep.subr.msk.bf16.mxu1 %vm15178_vm13, %v16114_v61 }
 0x412   : > { %12548 = vmatmul.mubr.f32.gmra.mrb[6].mxu1 %v14617_v63 }
 0x413   : > { %12554 = vmatprep.mubr.f32.mxu1 %v14598_v56 }
 0x416   : > { %12555 = vmatmul.mubr.f32.vlgmr.msra.gmra.mrb[4].mxu1 %v14615_v62 }
 0x417   : > { %13505 = vmatpush3.bf16.msk.msra.mxu1 %vm15178_vm13, %v16114_v61  ;;  %12557 = vmatprep.mubr.f32.mxu1 %v14625_v1 }
 0x418   : > { %13507 = vmatprep.subr.bf16.mxu1 %v13506_v4 }
 0x41a   : > { %12558 = vmatmul.mubr.f32.gmra.mrb[6].mxu1 %v14635_v7 }
 0x41b   : > { %12564 = vmatprep.mubr.f32.mxu1 %v14622_v0 }
 0x41e   : > { %12565 = vmatmul.mubr.f32.vlgmr.msra.gmra.mrb[4].mxu1 %v14632_v6 }
 0x41f   : > { %13509 = vmatpush3.bf16.msra.mxu1 %v13506_v4  ;;  %12567 = vmatprep.mubr.f32.mxu1 %v14641_v17  ;;  %v16164_v4 = vld [vmem:[#allocation10_spill] sm:$0xff] }
 0x420   : > { %13511 = vmatprep.subr.msk.bf16.mxu1 %vm15178_vm13, %v16114_v61 }
 0x422   : > { %12568 = vmatmul.mubr.f32.gmra.mrb[6].mxu1 %v14647_v25 }
 0x423   : > { %12574 = vmatprep.mubr.f32.mxu1 %v14583_v49 }
 0x426   : > { %12575 = vmatmul.mubr.f32.vlgmr.msra.gmra.mrb[4].mxu1 %v14594_v55 }
 0x427   : > { %13513 = vmatpush3.bf16.msk.msra.mxu1 %vm15178_vm13, %v16114_v61  ;;  %12577 = vmatprep.mubr.f32.mxu1 %v14600_v57 }
 0x42a   : > { %12578 = vmatmul.mubr.f32.gmra.mrb[6].mxu1 %v14617_v63 }
 0x42b   : > { %12584 = vmatprep.mubr.f32.mxu1 %v14583_v49 }
 0x42e   : > { %12585 = vmatmul.mubr.f32.vlgmr.msra.gmra.mrb[4].mxu1 %v14594_v55 }
 0x42f   : > { %12587 = vmatprep.mubr.f32.mxu1 %v14600_v57 }
 0x432   : > { %12588 = vmatmul.mubr.f32.gmra.mrb[6].mxu1 %v14617_v63 }
 0x433   : > { %12742 = vmatprep.mubr.f32.mxu1 %v14497_v30 }
 0x501   : > { %v12586_v58 = vpop.f32.mrb[4].mxu1 }
 0x502   : > { %v5256_v48 = vadd.f32 %v12586_v58, %v16160_v53  ;;  %v5233_v38 = vpop.f32.mrb[5].mxu1 }
 0x503   : > { %v5255_v54 = vadd.f32 %v5233_v38, %v16161_v46 }
 0x504   : > { %v15281_v29 = vsel %vm15272_vm5, %v5256_v48, %v16162_v52  ;;  %v16168_v52 = vld [vmem:[#allocation12_spill] sm:$0xff] }
 0x505   : > { %16163 = vst [vmem:[#allocation6_spill] sm:$0xff] %v15281_v29  ;;  %v5293_v44 = vand.u32 4294901760, %v15281_v29  ;;  %v15287_v60 = vsel %vm15272_vm5, %v5255_v54, %v16164_v4  ;;  %v12589_v43 = vpop.f32.mrb[6].mxu1 }
 0x506   : > { %16165 = vst [vmem:[#allocation10_spill] sm:$0xff] %v15287_v60  ;;  %v5290_v27 = vand.u32 4294901760, %v15287_v60  ;;  %v5258_v11 = vadd.f32 %v12589_v43, %v16166_v5  ;;  %v5245_v58 = vpop.f32.mrb[7].mxu1 }
 0x507   : > { %v5407_v38 = vsub.f32 %v15281_v29, %v5293_v44  ;;  %v5257_v47 = vadd.f32 %v5245_v58, %v16167_v35 }
 0x508   : > { %v15293_v46 = vpack.c.bf16 %v5293_v44, %v5290_v27  ;;  %v5400_v48 = vsub.f32 %v15287_v60, %v5290_v27  ;;  %v15299_v53 = vsel %vm15272_vm5, %v5258_v11, %v16168_v52 }
 0x509   : > { %16169 = vst [vmem:[#allocation12_spill] sm:$0xff] %v15299_v53  ;;  %v5299_v54 = vand.u32 4294901760, %v15299_v53  ;;  %v15305_v4 = vsel %vm15272_vm5, %v5257_v47, %v15132_v45  ;;  %v5408_v43 = vand.u32 4294901760, %v5407_v38 }
 0x50a   : > { %v5296_v5 = vand.u32 4294901760, %v15305_v4  ;;  %13515 = vmatprep.subr.bf16.mxu0 %v15293_v46  ;;  %v5401_v44 = vand.u32 4294901760, %v5400_v48 }
 0x50b   : > { %v5421_v27 = vsub.f32 %v15299_v53, %v5299_v54  ;;  %13517 = vmatpush3.bf16.msra.mxu0 %v15293_v46  ;;  %v5409_v58 = vsub.f32 %v5407_v38, %v5408_v43 }
 0x50c   : > { %v15311_v11 = vpack.c.bf16 %v5299_v54, %v5296_v5  ;;  %v5414_v52 = vsub.f32 %v15305_v4, %v5296_v5  ;;  %v5402_v35 = vsub.f32 %v5400_v48, %v5401_v44 }
 0x50d   : > { %v5410_v60 = vand.u32 4294901760, %v5409_v58  ;;  %v5422_v23 = vand.u32 4294901760, %v5421_v27  ;;  %v13530_v58 = vpack.c.bf16 %v5407_v38, %v5400_v48 }
 0x50e   : > { %13519 = vmatprep.subr.bf16.mxu0 %v15311_v11  ;;  %v5403_v45 = vand.u32 4294901760, %v5402_v35  ;;  %v5415_v47 = vand.u32 4294901760, %v5414_v52  ;;  %v13534_v35 = vpack.c.bf16 %v5421_v27, %v5414_v52 }
 0x50f   : > { %13521 = vmatpush3.bf16.msra.mxu0 %v15311_v11  ;;  %v5423_v29 = vsub.f32 %v5421_v27, %v5422_v23 }
 0x510   : > { %v13522_v42 = vpack.c.bf16 %v5410_v60, %v5403_v45  ;;  %v5416_v41 = vsub.f32 %v5414_v52, %v5415_v47 }
 0x511   : > { %v5424_v53 = vand.u32 4294901760, %v5423_v29  ;;  %v13550_v29 = vpack.c.bf16 %v5422_v23, %v5415_v47  ;;  %v6508_v23 = vsub.s32 5, %v14519_v36  ;;  %v15409_v47 = vld [vmem:[%s14709_s25] sm:$0x1]  ;;  %s11193_s25 = scalar_lea.sflag [#allocation3], %s305_s13 }
 0x512   : > { %12599 = vmatmul.mubr.f32.vlgmr.msra.gmra.mrb[8].mxu0 %v14499_v31  ;;  %13523 = vmatprep.subr.bf16.mxu0 %v13522_v42  ;;  %v5417_v54 = vand.u32 4294901760, %v5416_v41  ;;  %v13546_v41 = vpack.c.bf16 %v5408_v43, %v5401_v44  ;;  %vm6516_vm7 = vcmp.eq.s32.totalorder %v15409_v47, 6  ;;  %vm6495_vm11 = vcmp.gt.s32.totalorder %v15409_v47, 5 }
 0x513   : > { %13525 = vmatpush3.bf16.msra.mxu0 %v13522_v42  ;;  %12601 = vmatprep.mubr.f32.mxu0 %v14501_v32  ;;  %v6012_v42 = vsub.f32 %v15249_v51, %v15249_v51  ;;  %v15406_v45 = vrot.slane %v15233_v2, %v6508_v23  ;;  %vm7731_vm14 = vcmp.gt.s32.totalorder %v15409_v47, 6  ;;  %vm8967_vm5 = vcmp.gt.s32.totalorder %v15409_v47, 7 }
 0x514   : > { %v13526_v5 = vpack.c.bf16 %v5424_v53, %v5417_v54  ;;  %v6019_v53 = vsub.f32 %v15255_v59, %v15255_v59  ;;  %v6517_v54 = vsel %vm6516_vm7, 1, %v16115_v19 }
 0x515   : > { %v6013_v60 = vand.u32 4294901760, %v6012_v42  ;;  %vm6510_vm8 = vcmp.eq.s32.totalorder %v14519_v36, %v15406_v45  ;;  %vm6511_vm9 = vcmp.eq.s32.totalorder %v14539_v39, %v15406_v45 }
 0x516   : > { %12602 = vmatmul.mubr.f32.gmra.mrb[10].mxu0 %v14512_v34  ;;  %13527 = vmatprep.subr.bf16.mxu0 %v13526_v5  ;;  %v6020_v38 = vand.u32 4294901760, %v6019_v53  ;;  %v13570_v50 = vpack.c.bf16 %v6019_v53, %v6012_v42  ;;  %vm15528_vm13 = vmpackc.low %vm6511_vm9, %vm6510_vm8 }
 0x517   : > { %13529 = vmatpush3.bf16.msra.mxu0 %v13526_v5  ;;  %12612 = vmatprep.mubr.f32.mxu0 %v14440_v8  ;;  %v6014_v48 = vsub.f32 %v6012_v42, %v6013_v60  ;;  %v6521_v5 = vrot.slane %v6517_v54, %v14529_v37  ;;  %v16184_v54 = vld [vmem:[#allocation10_spill] sm:$0xff] }
 0x518   : > { %13531 = vmatprep.subr.bf16.mxu0 %v13530_v58  ;;  %v6021_v43 = vsub.f32 %v6019_v53, %v6020_v38 }
 0x519   : > { %v6015_v44 = vand.u32 4294901760, %v6014_v48  ;;  %vm6522_vm10 = vcmp.eq.s32.totalorder %v6521_v5, 1  ;;  %v6496_v48 = vsel %vm6495_vm11, 1, %v16115_v19  ;;  %vm7752_vm11 = vcmp.eq.s32.totalorder %v15409_v47, 7 }
 0x51a   : > { %12613 = vmatmul.mubr.f32.vlgmr.msra.gmra.mrb[8].mxu0 %v14442_v9  ;;  %v6022_v27 = vand.u32 4294901760, %v6021_v43  ;;  %v6500_v43 = vrot.slane %v6496_v48, %v14529_v37 }
 0x51b   : > { %13533 = vmatpush3.bf16.msra.mxu0 %v13530_v58  ;;  %12615 = vmatprep.mubr.f32.mxu0 %v14444_v10  ;;  %v15422_v58 = vsel %vm6510_vm8, 1.0, %v16116_v3 }
 0x51c   : > { %13535 = vmatprep.subr.bf16.mxu0 %v13534_v35  ;;  %vm15449_vm12 = vcmp.eq.s32.totalorder %v6500_v43, 1 }
 0x51e   : > { %12616 = vmatmul.mubr.f32.gmra.mrb[10].mxu0 %v14449_v13 }
 0x51f   : > { %13537 = vmatpush3.bf16.msra.mxu0 %v13534_v35  ;;  %12626 = vmatprep.mubr.f32.mxu0 %v14453_v14  ;;  %v15428_v35 = vsel %vm6511_vm9, 1.0, %v16116_v3 }
 0x520   : > { %13539 = vmatprep.subr.bf16.mxu0 %v15293_v46 }
 0x522   : > { %12627 = vmatmul.mubr.f32.vlgmr.msra.gmra.mrb[8].mxu0 %v14456_v15 }
 0x523   : > { %13541 = vmatpush3.bf16.msra.mxu0 %v15293_v46  ;;  %12629 = vmatprep.mubr.f32.mxu0 %v14459_v16 }
 0x524   : > { %13543 = vmatprep.subr.bf16.mxu0 %v15311_v11 }
 0x526   : > { %12630 = vmatmul.mubr.f32.gmra.mrb[10].mxu0 %v14465_v18 }
 0x527   : > { %13545 = vmatpush3.bf16.msra.mxu0 %v15311_v11  ;;  %12640 = vmatprep.mubr.f32.mxu0 %v14471_v20 }
 0x528   : > { %13547 = vmatprep.subr.bf16.mxu0 %v13546_v41 }
 0x52a   : > { %12641 = vmatmul.mubr.f32.vlgmr.msra.gmra.mrb[8].mxu0 %v14474_v21 }
 0x52b   : > { %13549 = vmatpush3.bf16.msra.mxu0 %v13546_v41  ;;  %12643 = vmatprep.mubr.f32.mxu0 %v14477_v22  ;;  %v16172_v41 = vld [vmem:[#allocation14_spill] sm:$0xff] }
 0x52c   : > { %13551 = vmatprep.subr.bf16.mxu0 %v13550_v29  ;;  %v16173_v42 = vsel %vm15257_vm2, %v15249_v51, %v16172_v41 }
 0x52d   : > { %v15436_v53 = vsel %vm6522_vm10, %v15422_v58, %v16173_v42 }
 0x52e   : > { %12644 = vmatmul.mubr.f32.gmra.mrb[10].mxu0 %v14483_v24  ;;  %16174 = vst [vmem:[#allocation14_spill] sm:$0xff] %v15436_v53 }
 0x52f   : > { %13553 = vmatpush3.bf16.msra.mxu0 %v13550_v29  ;;  %12654 = vmatprep.mubr.f32.mxu0 %v14440_v8  ;;  %v16175_v29 = vld [vmem:[#allocation5_spill] sm:$0xff] }
 0x530   : > { %13555 = vmatprep.subr.bf16.mxu0 %v15293_v46 }
 0x532   : > { %12655 = vmatmul.mubr.f32.vlgmr.msra.gmra.mrb[8].mxu0 %v14442_v9 }
 0x533   : > { %13557 = vmatpush3.bf16.msra.mxu0 %v15293_v46  ;;  %12657 = vmatprep.mubr.f32.mxu0 %v14444_v10  ;;  %v13566_v46 = vpack.c.bf16 %v6022_v27, %v6015_v44  ;;  %v16180_v27 = vld [vmem:[#allocation9_spill] sm:$0xff] }
 0x534   : > { %13559 = vmatprep.subr.bf16.mxu0 %v15311_v11 }
 0x536   : > { %12658 = vmatmul.mubr.f32.gmra.mrb[10].mxu0 %v14449_v13 }
 0x537   : > { %13561 = vmatpush3.bf16.msra.mxu0 %v15311_v11  ;;  %12668 = vmatprep.mubr.f32.mxu0 %v14440_v8  ;;  %v13578_v11 = vpack.c.bf16 %v6020_v38, %v6013_v60  ;;  %v16176_v60 = vsel %vm15257_vm2, %v15255_v59, %v16175_v29  ;;  %v16182_v59 = vld [vmem:[#allocation6_spill] sm:$0xff]  ;;  %v16186_v29 = vld [vmem:[#allocation11_spill] sm:$0xff] }
 0x538   : > { %13563 = vmatprep.subr.msk.bf16.mxu0 %vm15351_vm6, %v16114_v61  ;;  %v15444_v38 = vsel %vm6522_vm10, %v15428_v35, %v16176_v60  ;;  %vm14328_vm10 = vmmov 0  }
 0x539   : > { %16177 = vst [vmem:[#allocation5_spill] sm:$0xff] %v15444_v38 }
 0x53a   : > { %12669 = vmatmul.mubr.f32.vlgmr.msra.gmra.mrb[8].mxu0 %v14442_v9 }
 0x53b   : > { %13565 = vmatpush3.bf16.msk.msra.mxu0 %vm15351_vm6, %v16114_v61  ;;  %12671 = vmatprep.mubr.f32.mxu0 %v14444_v10 }
 0x53c   : > { %13567 = vmatprep.subr.bf16.mxu0 %v13566_v46 }
 0x53e   : > { %12672 = vmatmul.mubr.f32.gmra.mrb[10].mxu0 %v14449_v13 }
 0x53f   : > { %12678 = vmatprep.mubr.f32.mxu0 %v14653_v26 }
 0x542   : > { %12679 = vmatmul.mubr.f32.vlgmr.msra.gmra.mrb[8].mxu0 %v14658_v28 }
 0x543   : > { %13569 = vmatpush3.bf16.msra.mxu0 %v13566_v46  ;;  %12681 = vmatprep.mubr.f32.mxu0 %v14663_v33  ;;  %v16181_v46 = vld [vmem:[#allocation7_spill] sm:$0xff] }
 0x544   : > { %13571 = vmatprep.subr.bf16.mxu0 %v13570_v50 }
 0x546   : > { %12682 = vmatmul.mubr.f32.gmra.mrb[10].mxu0 %v14668_v40 }
 0x547   : > { %12688 = vmatprep.mubr.f32.mxu0 %v14583_v49 }
 0x54a   : > { %12689 = vmatmul.mubr.f32.vlgmr.msra.gmra.mrb[8].mxu0 %v14594_v55 }
 0x54b   : > { %13573 = vmatpush3.bf16.msra.mxu0 %v13570_v50  ;;  %12691 = vmatprep.mubr.f32.mxu0 %v14600_v57 }
 0x54c   : > { %13575 = vmatprep.subr.msk.bf16.mxu0 %vm15351_vm6, %v16114_v61 }
 0x54e   : > { %12692 = vmatmul.mubr.f32.gmra.mrb[10].mxu0 %v14617_v63 }
 0x54f   : > { %12698 = vmatprep.mubr.f32.mxu0 %v14598_v56 }
 0x552   : > { %12699 = vmatmul.mubr.f32.vlgmr.msra.gmra.mrb[8].mxu0 %v14615_v62 }
 0x553   : > { %13577 = vmatpush3.bf16.msk.msra.mxu0 %vm15351_vm6, %v16114_v61  ;;  %12701 = vmatprep.mubr.f32.mxu0 %v14625_v1 }
 0x554   : > { %13579 = vmatprep.subr.bf16.mxu0 %v13578_v11 }
 0x556   : > { %12702 = vmatmul.mubr.f32.gmra.mrb[10].mxu0 %v14635_v7 }
 0x557   : > { %12708 = vmatprep.mubr.f32.mxu0 %v14622_v0 }
 0x55a   : > { %12709 = vmatmul.mubr.f32.vlgmr.msra.gmra.mrb[8].mxu0 %v14632_v6 }
 0x55b   : > { %13581 = vmatpush3.bf16.msra.mxu0 %v13578_v11  ;;  %12711 = vmatprep.mubr.f32.mxu0 %v14641_v17 }
 0x55c   : > { %13583 = vmatprep.subr.msk.bf16.mxu0 %vm15351_vm6, %v16114_v61 }
 0x55e   : > { %12712 = vmatmul.mubr.f32.gmra.mrb[10].mxu0 %v14647_v25 }
 0x55f   : > { %12718 = vmatprep.mubr.f32.mxu0 %v14583_v49 }
 0x562   : > { %12719 = vmatmul.mubr.f32.vlgmr.msra.gmra.mrb[8].mxu0 %v14594_v55 }
 0x563   : > { %13585 = vmatpush3.bf16.msk.msra.mxu0 %vm15351_vm6, %v16114_v61  ;;  %12721 = vmatprep.mubr.f32.mxu0 %v14600_v57 }
 0x566   : > { %12722 = vmatmul.mubr.f32.gmra.mrb[10].mxu0 %v14617_v63 }
 0x567   : > { %12728 = vmatprep.mubr.f32.mxu0 %v14583_v49 }
 0x56a   : > { %12729 = vmatmul.mubr.f32.vlgmr.msra.gmra.mrb[8].mxu0 %v14594_v55 }
 0x56b   : > { %12731 = vmatprep.mubr.f32.mxu0 %v14600_v57 }
 0x56e   : > { %12732 = vmatmul.mubr.f32.gmra.mrb[10].mxu0 %v14617_v63 }
 0x56f   : > { %12886 = vmatprep.mubr.f32.mxu0 %v14497_v30 }
 0x63d   : > { %v12730_v44 = vpop.f32.mrb[8].mxu0 }
 0x63e   : > { %v6492_v52 = vadd.f32 %v12730_v44, %v16180_v27  ;;  %v6469_v12 = vpop.f32.mrb[9].mxu0  ;;  %v16187_v44 = vld [vmem:[#allocation8_spill] sm:$0xff] }
 0x63f   : > { %v6491_v50 = vadd.f32 %v6469_v12, %v16181_v46 }
 0x640   : > { %v15458_v11 = vsel %vm15449_vm12, %v6492_v52, %v16182_v59  ;;  %v16188_v59 = vld [vmem:[#allocation12_spill] sm:$0xff] }
 0x641   : > { %16183 = vst [vmem:[#allocation9_spill] sm:$0xff] %v15458_v11  ;;  %v6529_v23 = vand.u32 4294901760, %v15458_v11  ;;  %v15464_v5 = vsel %vm15449_vm12, %v6491_v50, %v16184_v54  ;;  %v12733_v41 = vpop.f32.mrb[10].mxu0 }
 0x642   : > { %16185 = vst [vmem:[#allocation7_spill] sm:$0xff] %v15464_v5  ;;  %v6526_v42 = vand.u32 4294901760, %v15464_v5  ;;  %v6494_v60 = vadd.f32 %v12733_v41, %v16186_v29  ;;  %v6481_v48 = vpop.f32.mrb[11].mxu0 }
 0x643   : > { %v6643_v43 = vsub.f32 %v15458_v11, %v6529_v23  ;;  %v6493_v12 = vadd.f32 %v6481_v48, %v16187_v44 }
 0x644   : > { %v15470_v38 = vpack.c.bf16 %v6529_v23, %v6526_v42  ;;  %v6636_v52 = vsub.f32 %v15464_v5, %v6526_v42  ;;  %v15476_v53 = vsel %vm15449_vm12, %v6494_v60, %v16188_v59 }
 0x645   : > { %16189 = vst [vmem:[#allocation6_spill] sm:$0xff] %v15476_v53  ;;  %v6535_v50 = vand.u32 4294901760, %v15476_v53  ;;  %v15482_v54 = vsel %vm15449_vm12, %v6493_v12, %v15305_v4  ;;  %v6644_v41 = vand.u32 4294901760, %v6643_v43  ;;  %vm8988_vm12 = vcmp.eq.s32.totalorder %v15409_v47, 8 }
 0x646   : > { %v6532_v3 = vand.u32 4294901760, %v15482_v54  ;;  %13587 = vmatprep.subr.bf16.mxu1 %v15470_v38  ;;  %v6637_v23 = vand.u32 4294901760, %v6636_v52 }
 0x647   : > { %v6657_v42 = vsub.f32 %v15476_v53, %v6535_v50  ;;  %13589 = vmatpush3.bf16.msra.mxu1 %v15470_v38  ;;  %v6645_v48 = vsub.f32 %v6643_v43, %v6644_v41 }
 0x648   : > { %v15488_v60 = vpack.c.bf16 %v6535_v50, %v6532_v3  ;;  %v6650_v59 = vsub.f32 %v15482_v54, %v6532_v3  ;;  %v6638_v2 = vsub.f32 %v6636_v52, %v6637_v23 }
 0x649   : > { %v6646_v44 = vand.u32 4294901760, %v6645_v48  ;;  %v6658_v51 = vand.u32 4294901760, %v6657_v42  ;;  %v13602_v48 = vpack.c.bf16 %v6643_v43, %v6636_v52 }
 0x64a   : > { %13591 = vmatprep.subr.bf16.mxu1 %v15488_v60  ;;  %v6639_v4 = vand.u32 4294901760, %v6638_v2  ;;  %v6651_v12 = vand.u32 4294901760, %v6650_v59  ;;  %v13606_v2 = vpack.c.bf16 %v6657_v42, %v6650_v59 }
 0x64b   : > { %13593 = vmatpush3.bf16.msra.mxu1 %v15488_v60  ;;  %v6659_v29 = vsub.f32 %v6657_v42, %v6658_v51 }
 0x64c   : > { %v13594_v5 = vpack.c.bf16 %v6646_v44, %v6639_v4  ;;  %v6652_v11 = vsub.f32 %v6650_v59, %v6651_v12 }
 0x64d   : > { %v6660_v53 = vand.u32 4294901760, %v6659_v29  ;;  %v13622_v29 = vpack.c.bf16 %v6658_v51, %v6651_v12 }
 0x64e   : > { %12743 = vmatmul.mubr.f32.vlgmr.msra.gmra.mrb[8].mxu1 %v14499_v31  ;;  %13595 = vmatprep.subr.bf16.mxu1 %v13594_v5  ;;  %v6653_v50 = vand.u32 4294901760, %v6652_v11  ;;  %v7248_v11 = vsub.f32 %v15422_v58, %v15422_v58 }
 0x64f   : > { %13597 = vmatpush3.bf16.msra.mxu1 %v13594_v5  ;;  %12745 = vmatprep.mubr.f32.mxu1 %v14501_v32  ;;  %v7255_v5 = vsub.f32 %v15428_v35, %v15428_v35 }
 0x650   : > { %v13598_v3 = vpack.c.bf16 %v6660_v53, %v6653_v50  ;;  %v13618_v53 = vpack.c.bf16 %v6644_v41, %v6637_v23  ;;  %v7249_v43 = vand.u32 4294901760, %v7248_v11 }
 0x651   : > { %v7256_v44 = vand.u32 4294901760, %v7255_v5  ;;  %v13642_v45 = vpack.c.bf16 %v7255_v5, %v7248_v11 }
 0x652   : > { %12746 = vmatmul.mubr.f32.gmra.mrb[10].mxu1 %v14512_v34  ;;  %13599 = vmatprep.subr.bf16.mxu1 %v13598_v3  ;;  %v7250_v58 = vsub.f32 %v7248_v11, %v7249_v43 }
 0x653   : > { %13601 = vmatpush3.bf16.msra.mxu1 %v13598_v3  ;;  %12756 = vmatprep.mubr.f32.mxu1 %v14440_v8  ;;  %v7257_v52 = vsub.f32 %v7255_v5, %v7256_v44  ;;  %v13650_v42 = vpack.c.bf16 %v7256_v44, %v7249_v43  ;;  %v16196_v43 = vld [vmem:[#allocation11_spill] sm:$0xff] }
 0x654   : > { %13603 = vmatprep.subr.bf16.mxu1 %v13602_v48  ;;  %v7251_v35 = vand.u32 4294901760, %v7250_v58 }
 0x655   : > { %v7258_v41 = vand.u32 4294901760, %v7257_v52 }
 0x656   : > { %12757 = vmatmul.mubr.f32.vlgmr.msra.gmra.mrb[8].mxu1 %v14442_v9 }
 0x657   : > { %13605 = vmatpush3.bf16.msra.mxu1 %v13602_v48  ;;  %12759 = vmatprep.mubr.f32.mxu1 %v14444_v10  ;;  %v16194_v48 = vld [vmem:[#allocation9_spill] sm:$0xff] }
 0x658   : > { %13607 = vmatprep.subr.bf16.mxu1 %v13606_v2 }
 0x65a   : > { %12760 = vmatmul.mubr.f32.gmra.mrb[10].mxu1 %v14449_v13 }
 0x65b   : > { %13609 = vmatpush3.bf16.msra.mxu1 %v13606_v2  ;;  %12770 = vmatprep.mubr.f32.mxu1 %v14453_v14 }
 0x65c   : > { %13611 = vmatprep.subr.bf16.mxu1 %v15470_v38 }
 0x65e   : > { %12771 = vmatmul.mubr.f32.vlgmr.msra.gmra.mrb[8].mxu1 %v14456_v15 }
 0x65f   : > { %13613 = vmatpush3.bf16.msra.mxu1 %v15470_v38  ;;  %12773 = vmatprep.mubr.f32.mxu1 %v14459_v16 }
 0x660   : > { %13615 = vmatprep.subr.bf16.mxu1 %v15488_v60 }
 0x662   : > { %12774 = vmatmul.mubr.f32.gmra.mrb[10].mxu1 %v14465_v18 }
 0x663   : > { %13617 = vmatpush3.bf16.msra.mxu1 %v15488_v60  ;;  %12784 = vmatprep.mubr.f32.mxu1 %v14471_v20 }
 0x664   : > { %13619 = vmatprep.subr.bf16.mxu1 %v13618_v53 }
 0x666   : > { %12785 = vmatmul.mubr.f32.vlgmr.msra.gmra.mrb[8].mxu1 %v14474_v21 }
 0x667   : > { %13621 = vmatpush3.bf16.msra.mxu1 %v13618_v53  ;;  %12787 = vmatprep.mubr.f32.mxu1 %v14477_v22  ;;  %v16195_v53 = vld [vmem:[#allocation7_spill] sm:$0xff] }
 0x668   : > { %13623 = vmatprep.subr.bf16.mxu1 %v13622_v29 }
 0x66a   : > { %12788 = vmatmul.mubr.f32.gmra.mrb[10].mxu1 %v14483_v24 }
 0x66b   : > { %13625 = vmatpush3.bf16.msra.mxu1 %v13622_v29  ;;  %12798 = vmatprep.mubr.f32.mxu1 %v14440_v8 }
 0x66c   : > { %13627 = vmatprep.subr.bf16.mxu1 %v15470_v38 }
 0x66e   : > { %12799 = vmatmul.mubr.f32.vlgmr.msra.gmra.mrb[8].mxu1 %v14442_v9 }
 0x66f   : > { %13629 = vmatpush3.bf16.msra.mxu1 %v15470_v38  ;;  %12801 = vmatprep.mubr.f32.mxu1 %v14444_v10  ;;  %v13638_v38 = vpack.c.bf16 %v7258_v41, %v7251_v35  ;;  %v16197_v35 = vld [vmem:[#allocation8_spill] sm:$0xff] }
 0x670   : > { %13631 = vmatprep.subr.bf16.mxu1 %v15488_v60 }
 0x672   : > { %12802 = vmatmul.mubr.f32.gmra.mrb[10].mxu1 %v14449_v13 }
 0x673   : > { %13633 = vmatpush3.bf16.msra.mxu1 %v15488_v60  ;;  %12812 = vmatprep.mubr.f32.mxu1 %v14440_v8  ;;  %v7732_v60 = vsel %vm7731_vm14, 1, %v16115_v19 }
 0x674   : > { %13635 = vmatprep.subr.msk.bf16.mxu1 %vm15528_vm13, %v16114_v61  ;;  %v7736_v59 = vrot.slane %v7732_v60, %v14529_v37 }
 0x676   : > { %12813 = vmatmul.mubr.f32.vlgmr.msra.gmra.mrb[8].mxu1 %v14442_v9  ;;  %vm15584_vm15 = vcmp.eq.s32.totalorder %v7736_v59, 1 }
 0x677   : > { %13637 = vmatpush3.bf16.msk.msra.mxu1 %vm15528_vm13, %v16114_v61  ;;  %12815 = vmatprep.mubr.f32.mxu1 %v14444_v10 }
 0x678   : > { %13639 = vmatprep.subr.bf16.mxu1 %v13638_v38 }
 0x67a   : > { %12816 = vmatmul.mubr.f32.gmra.mrb[10].mxu1 %v14449_v13 }
 0x67b   : > { %12822 = vmatprep.mubr.f32.mxu1 %v14653_v26 }
 0x67e   : > { %12823 = vmatmul.mubr.f32.vlgmr.msra.gmra.mrb[8].mxu1 %v14658_v28 }
 0x67f   : > { %13641 = vmatpush3.bf16.msra.mxu1 %v13638_v38  ;;  %12825 = vmatprep.mubr.f32.mxu1 %v14663_v33 }
 0x680   : > { %13643 = vmatprep.subr.bf16.mxu1 %v13642_v45 }
 0x682   : > { %12826 = vmatmul.mubr.f32.gmra.mrb[10].mxu1 %v14668_v40 }
 0x683   : > { %12832 = vmatprep.mubr.f32.mxu1 %v14583_v49 }
 0x686   : > { %12833 = vmatmul.mubr.f32.vlgmr.msra.gmra.mrb[8].mxu1 %v14594_v55 }
 0x687   : > { %13645 = vmatpush3.bf16.msra.mxu1 %v13642_v45  ;;  %12835 = vmatprep.mubr.f32.mxu1 %v14600_v57  ;;  %v16198_v45 = vld [vmem:[#allocation6_spill] sm:$0xff] }
 0x688   : > { %13647 = vmatprep.subr.msk.bf16.mxu1 %vm15528_vm13, %v16114_v61 }
 0x68a   : > { %12836 = vmatmul.mubr.f32.gmra.mrb[10].mxu1 %v14617_v63 }
 0x68b   : > { %12842 = vmatprep.mubr.f32.mxu1 %v14598_v56 }
 0x68e   : > { %12843 = vmatmul.mubr.f32.vlgmr.msra.gmra.mrb[8].mxu1 %v14615_v62 }
 0x68f   : > { %13649 = vmatpush3.bf16.msk.msra.mxu1 %vm15528_vm13, %v16114_v61  ;;  %12845 = vmatprep.mubr.f32.mxu1 %v14625_v1 }
 0x690   : > { %13651 = vmatprep.subr.bf16.mxu1 %v13650_v42 }
 0x692   : > { %12846 = vmatmul.mubr.f32.gmra.mrb[10].mxu1 %v14635_v7 }
 0x693   : > { %12852 = vmatprep.mubr.f32.mxu1 %v14622_v0 }
 0x696   : > { %12853 = vmatmul.mubr.f32.vlgmr.msra.gmra.mrb[8].mxu1 %v14632_v6 }
 0x697   : > { %13653 = vmatpush3.bf16.msra.mxu1 %v13650_v42  ;;  %12855 = vmatprep.mubr.f32.mxu1 %v14641_v17 }
 0x698   : > { %13655 = vmatprep.subr.msk.bf16.mxu1 %vm15528_vm13, %v16114_v61 }
 0x69a   : > { %12856 = vmatmul.mubr.f32.gmra.mrb[10].mxu1 %v14647_v25 }
 0x69b   : > { %12862 = vmatprep.mubr.f32.mxu1 %v14583_v49 }
 0x69e   : > { %12863 = vmatmul.mubr.f32.vlgmr.msra.gmra.mrb[8].mxu1 %v14594_v55 }
 0x69f   : > { %13657 = vmatpush3.bf16.msk.msra.mxu1 %vm15528_vm13, %v16114_v61  ;;  %12865 = vmatprep.mubr.f32.mxu1 %v14600_v57 }
 0x6a2   : > { %12866 = vmatmul.mubr.f32.gmra.mrb[10].mxu1 %v14617_v63 }
 0x6a3   : > { %12872 = vmatprep.mubr.f32.mxu1 %v14583_v49 }
 0x6a6   : > { %12873 = vmatmul.mubr.f32.vlgmr.msra.gmra.mrb[8].mxu1 %v14594_v55 }
 0x6a7   : > { %12875 = vmatprep.mubr.f32.mxu1 %v14600_v57 }
 0x6aa   : > { %12876 = vmatmul.mubr.f32.gmra.mrb[10].mxu1 %v14617_v63 }
 0x6ab   : > { %13030 = vmatprep.mubr.f32.mxu1 %v14497_v30 }
 0x779   : > { %v12874_v51 = vpop.f32.mrb[8].mxu1 }
 0x77a   : > { %v7728_v12 = vadd.f32 %v12874_v51, %v16180_v27  ;;  %v7705_v50 = vpop.f32.mrb[9].mxu1 }
 0x77b   : > { %v7727_v3 = vadd.f32 %v7705_v50, %v16181_v46 }
 0x77c   : > { %v15593_v30 = vsel %vm15584_vm15, %v7728_v12, %v16194_v48 }
 0x77d   : > { %v7765_v2 = vand.u32 4294901760, %v15593_v30  ;;  %v15599_v11 = vsel %vm15584_vm15, %v7727_v3, %v16195_v53  ;;  %v12877_v5 = vpop.f32.mrb[10].mxu1 }
 0x77e   : > { %v7762_v29 = vand.u32 4294901760, %v15599_v11  ;;  %v7730_v44 = vadd.f32 %v12877_v5, %v16196_v43  ;;  %v7717_v58 = vpop.f32.mrb[11].mxu1 }
 0x77f   : > { %v7879_v52 = vsub.f32 %v15593_v30, %v7765_v2  ;;  %v7729_v41 = vadd.f32 %v7717_v58, %v16197_v35 }
 0x780   : > { %v15605_v23 = vpack.c.bf16 %v7765_v2, %v7762_v29  ;;  %v7872_v38 = vsub.f32 %v15599_v11, %v7762_v29  ;;  %v15611_v42 = vsel %vm15584_vm15, %v7730_v44, %v16198_v45 }
 0x781   : > { %16199 = vst [vmem:[#allocation10_spill] sm:$0xff] %v15611_v42  ;;  %v7771_v60 = vand.u32 4294901760, %v15611_v42  ;;  %v15617_v59 = vsel %vm15584_vm15, %v7729_v41, %v15482_v54  ;;  %v7880_v51 = vand.u32 4294901760, %v7879_v52  ;;  %vm10203_vm15 = vcmp.gt.s32.totalorder %v15409_v47, 8 }
 0x782   : > { %v7768_v12 = vand.u32 4294901760, %v15617_v59  ;;  %13659 = vmatprep.subr.bf16.mxu0 %v15605_v23  ;;  %v7873_v50 = vand.u32 4294901760, %v7872_v38 }
 0x783   : > { %v7893_v3 = vsub.f32 %v15611_v42, %v7771_v60  ;;  %13661 = vmatpush3.bf16.msra.mxu0 %v15605_v23  ;;  %v7881_v48 = vsub.f32 %v7879_v52, %v7880_v51 }
 0x784   : > { %v15623_v2 = vpack.c.bf16 %v7771_v60, %v7768_v12  ;;  %v7886_v53 = vsub.f32 %v15617_v59, %v7768_v12  ;;  %v7874_v5 = vsub.f32 %v7872_v38, %v7873_v50 }
 0x785   : > { %v7882_v29 = vand.u32 4294901760, %v7881_v48  ;;  %v7894_v4 = vand.u32 4294901760, %v7893_v3  ;;  %v13674_v48 = vpack.c.bf16 %v7879_v52, %v7872_v38  ;;  %v16201_v52 = vmov 0.0  }
 0x786   : > { %13663 = vmatprep.subr.bf16.mxu0 %v15623_v2  ;;  %v7875_v54 = vand.u32 4294901760, %v7874_v5  ;;  %v7887_v44 = vand.u32 4294901760, %v7886_v53  ;;  %v13678_v5 = vpack.c.bf16 %v7893_v3, %v7886_v53 }
 0x787   : > { %13665 = vmatpush3.bf16.msra.mxu0 %v15623_v2  ;;  %v7895_v58 = vsub.f32 %v7893_v3, %v7894_v4 }
 0x788   : > { %v13666_v41 = vpack.c.bf16 %v7882_v29, %v7875_v54  ;;  %v7888_v45 = vsub.f32 %v7886_v53, %v7887_v44  ;;  %v7744_v29 = vsub.s32 6, %v14519_v36  ;;  %v13690_v53 = vpack.c.bf16 %v7880_v51, %v7873_v50 }
 0x789   : > { %v7896_v42 = vand.u32 4294901760, %v7895_v58 }
 0x78a   : > { %12887 = vmatmul.mubr.f32.vlgmr.msra.gmra.mrb[12].mxu0 %v14499_v31  ;;  %13667 = vmatprep.subr.bf16.mxu0 %v13666_v41  ;;  %v7889_v60 = vand.u32 4294901760, %v7888_v45  ;;  %v13694_v45 = vpack.c.bf16 %v7894_v4, %v7887_v44 }
 0x78b   : > { %13669 = vmatpush3.bf16.msra.mxu0 %v13666_v41  ;;  %12889 = vmatprep.mubr.f32.mxu0 %v14501_v32 }
 0x78c   : > { %v13670_v12 = vpack.c.bf16 %v7896_v42, %v7889_v60  ;;  %v16200_v42 = vld [vmem:[#allocation13_spill] sm:$0xff] }
 0x78d   : > { %v7745_v54 = vrot.slane %v16200_v42, %v7744_v29  ;;  %v8968_v29 = vsel %vm8967_vm5, 1, %v16115_v19 }
 0x78e   : > { %12890 = vmatmul.mubr.f32.gmra.mrb[14].mxu0 %v14512_v34  ;;  %13671 = vmatprep.subr.bf16.mxu0 %v13670_v12 }
 0x78f   : > { %13673 = vmatpush3.bf16.msra.mxu0 %v13670_v12  ;;  %12900 = vmatprep.mubr.f32.mxu0 %v14440_v8  ;;  %vm7746_vm1 = vcmp.eq.s32.totalorder %v14519_v36, %v7745_v54  ;;  %vm7747_vm2 = vcmp.eq.s32.totalorder %v14539_v39, %v7745_v54  ;;  %v8972_v54 = vrot.slane %v8968_v29, %v14529_v37 }
 0x790   : > { %13675 = vmatprep.subr.bf16.mxu0 %v13674_v48  ;;  %v15648_v38 = vsel %vm7746_vm1, 1.0, %v16201_v52  ;;  %v15653_v3 = vsel %vm7747_vm2, 1.0, %v16201_v52  ;;  %vm15675_vm4 = vmpackc.low %vm7747_vm2, %vm7746_vm1 }
 0x791   : > { %v8484_v58 = vsub.f32 %v15648_v38, %v15648_v38  ;;  %v8491_v41 = vsub.f32 %v15653_v3, %v15653_v3  ;;  %vm15730_vm6 = vcmp.eq.s32.totalorder %v8972_v54, 1  ;;  %v16208_v54 = vld [vmem:[#allocation10_spill] sm:$0xff] }
 0x792   : > { %12901 = vmatmul.mubr.f32.vlgmr.msra.gmra.mrb[12].mxu0 %v14442_v9 }
 0x793   : > { %13677 = vmatpush3.bf16.msra.mxu0 %v13674_v48  ;;  %12903 = vmatprep.mubr.f32.mxu0 %v14444_v10  ;;  %v8485_v60 = vand.u32 4294901760, %v8484_v58  ;;  %v8492_v51 = vand.u32 4294901760, %v8491_v41 }
 0x794   : > { %13679 = vmatprep.subr.bf16.mxu0 %v13678_v5 }
 0x795   : > { %v8486_v50 = vsub.f32 %v8484_v58, %v8485_v60  ;;  %v8493_v12 = vsub.f32 %v8491_v41, %v8492_v51 }
 0x796   : > { %12904 = vmatmul.mubr.f32.gmra.mrb[14].mxu0 %v14449_v13 }
 0x797   : > { %13681 = vmatpush3.bf16.msra.mxu0 %v13678_v5  ;;  %12914 = vmatprep.mubr.f32.mxu0 %v14453_v14  ;;  %v8487_v4 = vand.u32 4294901760, %v8486_v50  ;;  %v8494_v44 = vand.u32 4294901760, %v8493_v12  ;;  %v13722_v5 = vpack.c.bf16 %v8492_v51, %v8485_v60 }
 0x798   : > { %13683 = vmatprep.subr.bf16.mxu0 %v15605_v23 }
 0x79a   : > { %12915 = vmatmul.mubr.f32.vlgmr.msra.gmra.mrb[12].mxu0 %v14456_v15 }
 0x79b   : > { %13685 = vmatpush3.bf16.msra.mxu0 %v15605_v23  ;;  %12917 = vmatprep.mubr.f32.mxu0 %v14459_v16 }
 0x79c   : > { %13687 = vmatprep.subr.bf16.mxu0 %v15623_v2 }
 0x79e   : > { %12918 = vmatmul.mubr.f32.gmra.mrb[14].mxu0 %v14465_v18 }
 0x79f   : > { %13689 = vmatpush3.bf16.msra.mxu0 %v15623_v2  ;;  %12928 = vmatprep.mubr.f32.mxu0 %v14471_v20 }
 0x7a0   : > { %13691 = vmatprep.subr.bf16.mxu0 %v13690_v53 }
 0x7a2   : > { %12929 = vmatmul.mubr.f32.vlgmr.msra.gmra.mrb[12].mxu0 %v14474_v21 }
 0x7a3   : > { %13693 = vmatpush3.bf16.msra.mxu0 %v13690_v53  ;;  %12931 = vmatprep.mubr.f32.mxu0 %v14477_v22 }
 0x7a4   : > { %13695 = vmatprep.subr.bf16.mxu0 %v13694_v45 }
 0x7a6   : > { %12932 = vmatmul.mubr.f32.gmra.mrb[14].mxu0 %v14483_v24 }
 0x7a7   : > { %13697 = vmatpush3.bf16.msra.mxu0 %v13694_v45  ;;  %12942 = vmatprep.mubr.f32.mxu0 %v14440_v8 }
 0x7a8   : > { %13699 = vmatprep.subr.bf16.mxu0 %v15605_v23 }
 0x7aa   : > { %12943 = vmatmul.mubr.f32.vlgmr.msra.gmra.mrb[12].mxu0 %v14442_v9 }
 0x7ab   : > { %13701 = vmatpush3.bf16.msra.mxu0 %v15605_v23  ;;  %12945 = vmatprep.mubr.f32.mxu0 %v14444_v10  ;;  %v13710_v23 = vpack.c.bf16 %v8494_v44, %v8487_v4 }
 0x7ac   : > { %13703 = vmatprep.subr.bf16.mxu0 %v15623_v2 }
 0x7ae   : > { %12946 = vmatmul.mubr.f32.gmra.mrb[14].mxu0 %v14449_v13 }
 0x7af   : > { %13705 = vmatpush3.bf16.msra.mxu0 %v15623_v2  ;;  %12956 = vmatprep.mubr.f32.mxu0 %v14440_v8  ;;  %v13714_v2 = vpack.c.bf16 %v8491_v41, %v8484_v58 }
 0x7b0   : > { %13707 = vmatprep.subr.msk.bf16.mxu0 %vm15675_vm4, %v16114_v61 }
 0x7b2   : > { %12957 = vmatmul.mubr.f32.vlgmr.msra.gmra.mrb[12].mxu0 %v14442_v9 }
 0x7b3   : > { %13709 = vmatpush3.bf16.msk.msra.mxu0 %vm15675_vm4, %v16114_v61  ;;  %12959 = vmatprep.mubr.f32.mxu0 %v14444_v10 }
 0x7b4   : > { %13711 = vmatprep.subr.bf16.mxu0 %v13710_v23 }
 0x7b6   : > { %12960 = vmatmul.mubr.f32.gmra.mrb[14].mxu0 %v14449_v13 }
 0x7b7   : > { %12966 = vmatprep.mubr.f32.mxu0 %v14653_v26 }
 0x7ba   : > { %12967 = vmatmul.mubr.f32.vlgmr.msra.gmra.mrb[12].mxu0 %v14658_v28 }
 0x7bb   : > { %13713 = vmatpush3.bf16.msra.mxu0 %v13710_v23  ;;  %12969 = vmatprep.mubr.f32.mxu0 %v14663_v33 }
 0x7bc   : > { %13715 = vmatprep.subr.bf16.mxu0 %v13714_v2 }
 0x7be   : > { %12970 = vmatmul.mubr.f32.gmra.mrb[14].mxu0 %v14668_v40 }
 0x7bf   : > { %12976 = vmatprep.mubr.f32.mxu0 %v14583_v49 }
 0x7c2   : > { %12977 = vmatmul.mubr.f32.vlgmr.msra.gmra.mrb[12].mxu0 %v14594_v55 }
 0x7c3   : > { %13717 = vmatpush3.bf16.msra.mxu0 %v13714_v2  ;;  %12979 = vmatprep.mubr.f32.mxu0 %v14600_v57 }
 0x7c4   : > { %13719 = vmatprep.subr.msk.bf16.mxu0 %vm15675_vm4, %v16114_v61 }
 0x7c6   : > { %12980 = vmatmul.mubr.f32.gmra.mrb[14].mxu0 %v14617_v63 }
 0x7c7   : > { %12986 = vmatprep.mubr.f32.mxu0 %v14598_v56 }
 0x7ca   : > { %12987 = vmatmul.mubr.f32.vlgmr.msra.gmra.mrb[12].mxu0 %v14615_v62 }
 0x7cb   : > { %13721 = vmatpush3.bf16.msk.msra.mxu0 %vm15675_vm4, %v16114_v61  ;;  %12989 = vmatprep.mubr.f32.mxu0 %v14625_v1 }
 0x7cc   : > { %13723 = vmatprep.subr.bf16.mxu0 %v13722_v5 }
 0x7ce   : > { %12990 = vmatmul.mubr.f32.gmra.mrb[14].mxu0 %v14635_v7 }
 0x7cf   : > { %12996 = vmatprep.mubr.f32.mxu0 %v14622_v0 }
 0x7d2   : > { %12997 = vmatmul.mubr.f32.vlgmr.msra.gmra.mrb[12].mxu0 %v14632_v6 }
 0x7d3   : > { %13725 = vmatpush3.bf16.msra.mxu0 %v13722_v5  ;;  %12999 = vmatprep.mubr.f32.mxu0 %v14641_v17 }
 0x7d4   : > { %13727 = vmatprep.subr.msk.bf16.mxu0 %vm15675_vm4, %v16114_v61 }
 0x7d6   : > { %13000 = vmatmul.mubr.f32.gmra.mrb[14].mxu0 %v14647_v25 }
 0x7d7   : > { %13006 = vmatprep.mubr.f32.mxu0 %v14583_v49 }
 0x7da   : > { %13007 = vmatmul.mubr.f32.vlgmr.msra.gmra.mrb[12].mxu0 %v14594_v55 }
 0x7db   : > { %13729 = vmatpush3.bf16.msk.msra.mxu0 %vm15675_vm4, %v16114_v61  ;;  %13009 = vmatprep.mubr.f32.mxu0 %v14600_v57 }
 0x7de   : > { %13010 = vmatmul.mubr.f32.gmra.mrb[14].mxu0 %v14617_v63 }
 0x7df   : > { %13016 = vmatprep.mubr.f32.mxu0 %v14583_v49 }
 0x7e2   : > { %13017 = vmatmul.mubr.f32.vlgmr.msra.gmra.mrb[12].mxu0 %v14594_v55 }
 0x7e3   : > { %13019 = vmatprep.mubr.f32.mxu0 %v14600_v57 }
 0x7e6   : > { %13020 = vmatmul.mubr.f32.gmra.mrb[14].mxu0 %v14617_v63 }
 0x7e7   : > { %13174 = vmatprep.mubr.msk.f32.mxu0 %vm14328_vm10, %v16201_v52 }
 0x8b5   : > { %v13018_v53 = vpop.f32.mrb[12].mxu0 }
 0x8b6   : > { %v8964_v41 = vadd.f32 %v13018_v53, %v16180_v27  ;;  %v8941_v45 = vpop.f32.mrb[13].mxu0 }
 0x8b7   : > { %v8963_v60 = vadd.f32 %v8941_v45, %v16181_v46 }
 0x8b8   : > { %v15739_v51 = vsel %vm15730_vm6, %v8964_v41, %v15593_v30 }
 0x8b9   : > { %16206 = vst [vmem:[#allocation12_spill] sm:$0xff] %v15739_v51  ;;  %v9001_v50 = vand.u32 4294901760, %v15739_v51  ;;  %v15745_v12 = vsel %vm15730_vm6, %v8963_v60, %v15599_v11  ;;  %v13021_v4 = vpop.f32.mrb[14].mxu0 }
 0x8ba   : > { %16207 = vst [vmem:[#allocation9_spill] sm:$0xff] %v15745_v12  ;;  %v8998_v44 = vand.u32 4294901760, %v15745_v12  ;;  %v8966_v48 = vadd.f32 %v13021_v4, %v16196_v43  ;;  %v8953_v23 = vpop.f32.mrb[15].mxu0 }
 0x8bb   : > { %v9115_v2 = vsub.f32 %v15739_v51, %v9001_v50  ;;  %v8965_v5 = vadd.f32 %v8953_v23, %v16197_v35 }
 0x8bc   : > { %v15751_v29 = vpack.c.bf16 %v9001_v50, %v8998_v44  ;;  %v9108_v30 = vsub.f32 %v15745_v12, %v8998_v44  ;;  %v15757_v53 = vsel %vm15730_vm6, %v8966_v48, %v16208_v54 }
 0x8bd   : > { %16209 = vst [vmem:[#allocation7_spill] sm:$0xff] %v15757_v53  ;;  %v9007_v11 = vand.u32 4294901760, %v15757_v53  ;;  %v15763_v41 = vsel %vm15730_vm6, %v8965_v5, %v15617_v59  ;;  %v9116_v45 = vand.u32 4294901760, %v9115_v2 }
 0x8be   : > { %v9004_v60 = vand.u32 4294901760, %v15763_v41  ;;  %13731 = vmatprep.subr.bf16.mxu1 %v15751_v29  ;;  %v9109_v50 = vand.u32 4294901760, %v9108_v30 }
 0x8bf   : > { %v9129_v4 = vsub.f32 %v15757_v53, %v9007_v11  ;;  %13733 = vmatpush3.bf16.msra.mxu1 %v15751_v29  ;;  %v9117_v44 = vsub.f32 %v9115_v2, %v9116_v45 }
 0x8c0   : > { %v15769_v48 = vpack.c.bf16 %v9007_v11, %v9004_v60  ;;  %v9122_v23 = vsub.f32 %v15763_v41, %v9004_v60  ;;  %v9110_v54 = vsub.f32 %v9108_v30, %v9109_v50 }
 0x8c1   : > { %v9118_v35 = vand.u32 4294901760, %v9117_v44  ;;  %v9130_v58 = vand.u32 4294901760, %v9129_v4  ;;  %v13746_v44 = vpack.c.bf16 %v9115_v2, %v9108_v30 }
 0x8c2   : > { %13735 = vmatprep.subr.bf16.mxu1 %v15769_v48  ;;  %v9111_v59 = vand.u32 4294901760, %v9110_v54  ;;  %v9123_v5 = vand.u32 4294901760, %v9122_v23 }
 0x8c3   : > { %13737 = vmatpush3.bf16.msra.mxu1 %v15769_v48  ;;  %v9131_v43 = vsub.f32 %v9129_v4, %v9130_v58 }
 0x8c4   : > { %v13738_v12 = vpack.c.bf16 %v9118_v35, %v9111_v59  ;;  %v9124_v51 = vsub.f32 %v9122_v23, %v9123_v5  ;;  %v13750_v35 = vpack.c.bf16 %v9129_v4, %v9122_v23 }
 0x8c5   : > { %v9132_v53 = vand.u32 4294901760, %v9131_v43  ;;  %v8980_v43 = vsub.s32 7, %v14519_v36 }
 0x8c6   : > { %13031 = vmatmul.mubr.f32.vlgmr.msra.gmra.mrb[12].mxu1 %v14499_v31  ;;  %13739 = vmatprep.subr.bf16.mxu1 %v13738_v12  ;;  %v9125_v11 = vand.u32 4294901760, %v9124_v51 }
 0x8c7   : > { %13741 = vmatpush3.bf16.msra.mxu1 %v13738_v12  ;;  %13033 = vmatprep.mubr.f32.mxu1 %v14501_v32  ;;  %v8981_v31 = vrot.slane %v16200_v42, %v8980_v43  ;;  %v13766_v42 = vpack.c.bf16 %v9130_v58, %v9123_v5 }
 0x8c8   : > { %v13742_v60 = vpack.c.bf16 %v9132_v53, %v9125_v11  ;;  %v10215_v53 = vld [vmem:[%s16050_s6] sm:$0xff] }
 0x8c9   : > { %vm8982_vm7 = vcmp.eq.s32.totalorder %v14519_v36, %v8981_v31  ;;  %vm8983_vm8 = vcmp.eq.s32.totalorder %v14539_v39, %v8981_v31  ;;  %v8989_v39 = vsel %vm8988_vm12, 1, %v16115_v19 }
 0x8ca   : > { %13034 = vmatmul.mubr.f32.gmra.mrb[14].mxu1 %v14512_v34  ;;  %13743 = vmatprep.subr.bf16.mxu1 %v13742_v60  ;;  %v15794_v32 = vsel %vm8982_vm7, 1.0, %v16201_v52  ;;  %vm15821_vm9 = vmpackc.low %vm8983_vm8, %vm8982_vm7 }
 0x8cb   : > { %13745 = vmatpush3.bf16.msra.mxu1 %v13742_v60  ;;  %13044 = vmatprep.mubr.f32.mxu1 %v14440_v8  ;;  %v16217_v60 = vld [vmem:[#allocation9_spill] sm:$0xff] }
 0x8cc   : > { %13747 = vmatprep.subr.bf16.mxu1 %v13746_v44 }
 0x8ce   : > { %13045 = vmatmul.mubr.f32.vlgmr.msra.gmra.mrb[12].mxu1 %v14442_v9 }
 0x8cf   : > { %13749 = vmatpush3.bf16.msra.mxu1 %v13746_v44  ;;  %13047 = vmatprep.mubr.f32.mxu1 %v14444_v10 }
 0x8d0   : > { %13751 = vmatprep.subr.bf16.mxu1 %v13750_v35 }
 0x8d2   : > { %13048 = vmatmul.mubr.f32.gmra.mrb[14].mxu1 %v14449_v13 }
 0x8d3   : > { %13753 = vmatpush3.bf16.msra.mxu1 %v13750_v35  ;;  %13058 = vmatprep.mubr.f32.mxu1 %v14453_v14  ;;  %v15799_v14 = vsel %vm8983_vm8, 1.0, %v16201_v52 }
 0x8d4   : > { %13755 = vmatprep.subr.bf16.mxu1 %v15751_v29  ;;  %v9727_v34 = vsub.f32 %v15799_v14, %v15799_v14 }
 0x8d6   : > { %13059 = vmatmul.mubr.f32.vlgmr.msra.gmra.mrb[12].mxu1 %v14456_v15  ;;  %v13762_v15 = vpack.c.bf16 %v9116_v45, %v9109_v50  ;;  %v9728_v51 = vand.u32 4294901760, %v9727_v34  ;;  %v10204_v45 = vsel %vm10203_vm15, 1, %v16115_v19  ;;  %v10217_v50 = vsel %vm351_vm0, %v10215_v53, 0 }
 0x8d7   : > { %13757 = vmatpush3.bf16.msra.mxu1 %v15751_v29  ;;  %13061 = vmatprep.mubr.f32.mxu1 %v14459_v16  ;;  %v9720_v16 = vsub.f32 %v15794_v32, %v15794_v32  ;;  %v10208_v4 = vrot.slane %v10204_v45, %v14529_v37 }
 0x8d8   : > { %13759 = vmatprep.subr.bf16.mxu1 %v15769_v48  ;;  %v9729_v12 = vsub.f32 %v9727_v34, %v9728_v51 }
 0x8d9   : > { %v13786_v36 = vpack.c.bf16 %v9727_v34, %v9720_v16  ;;  %vm15916_vm1 = vcmp.eq.s32.totalorder %v10208_v4, 1 }
 0x8da   : > { %13062 = vmatmul.mubr.f32.gmra.mrb[14].mxu1 %v14465_v18  ;;  %v9721_v18 = vand.u32 4294901760, %v9720_v16 }
 0x8db   : > { %13761 = vmatpush3.bf16.msra.mxu1 %v15769_v48  ;;  %13072 = vmatprep.mubr.f32.mxu1 %v14471_v20 }
 0x8dc   : > { %13763 = vmatprep.subr.bf16.mxu1 %v13762_v15  ;;  %v9722_v20 = vsub.f32 %v9720_v16, %v9721_v18  ;;  %v16219_v16 = vld [vmem:[#allocation8_spill] sm:$0xff] }
 0x8de   : > { %13073 = vmatmul.mubr.f32.vlgmr.msra.gmra.mrb[12].mxu1 %v14474_v21  ;;  %v9723_v21 = vand.u32 4294901760, %v9722_v20 }
 0x8df   : > { %13765 = vmatpush3.bf16.msra.mxu1 %v13762_v15  ;;  %13075 = vmatprep.mubr.f32.mxu1 %v14477_v22  ;;  %v9730_v22 = vand.u32 4294901760, %v9729_v12 }
 0x8e0   : > { %13767 = vmatprep.subr.bf16.mxu1 %v13766_v42 }
 0x8e1   : > { %v13782_v2 = vpack.c.bf16 %v9730_v22, %v9723_v21 }
 0x8e2   : > { %13076 = vmatmul.mubr.f32.gmra.mrb[14].mxu1 %v14483_v24 }
 0x8e3   : > { %13769 = vmatpush3.bf16.msra.mxu1 %v13766_v42  ;;  %13086 = vmatprep.mubr.f32.mxu1 %v14440_v8  ;;  %v16220_v42 = vld [vmem:[#allocation7_spill] sm:$0xff] }
 0x8e4   : > { %13771 = vmatprep.subr.bf16.mxu1 %v15751_v29 }
 0x8e6   : > { %13087 = vmatmul.mubr.f32.vlgmr.msra.gmra.mrb[12].mxu1 %v14442_v9 }
 0x8e7   : > { %13773 = vmatpush3.bf16.msra.mxu1 %v15751_v29  ;;  %13089 = vmatprep.mubr.f32.mxu1 %v14444_v10 }
 0x8e8   : > { %13775 = vmatprep.subr.bf16.mxu1 %v15769_v48 }
 0x8ea   : > { %13090 = vmatmul.mubr.f32.gmra.mrb[14].mxu1 %v14449_v13 }
 0x8eb   : > { %13777 = vmatpush3.bf16.msra.mxu1 %v15769_v48  ;;  %13100 = vmatprep.mubr.f32.mxu1 %v14440_v8  ;;  %v13794_v8 = vpack.c.bf16 %v9728_v51, %v9721_v18  ;;  %v15914_v48 = vand.u32 4294901760, %v10217_v50 }
 0x8ec   : > { %13779 = vmatprep.subr.msk.bf16.mxu1 %vm15821_vm9, %v16114_v61 }
 0x8ed   : > { %v15921_v58 = vsub.f32 %v10217_v50, %v15914_v48 }
 0x8ee   : > { %13101 = vmatmul.mubr.f32.vlgmr.msra.gmra.mrb[12].mxu1 %v14442_v9  ;;  %v14327_v9 = vmov 0.0|0.0  }
 0x8ef   : > { %13781 = vmatpush3.bf16.msk.msra.mxu1 %vm15821_vm9, %v16114_v61  ;;  %13103 = vmatprep.mubr.f32.mxu1 %v14444_v10  ;;  %v7753_v10 = vsel %vm7752_vm11, 1, %v16115_v19  ;;  %v16216_v19 = vld [vmem:[#allocation12_spill] sm:$0xff]  ;;  %v10290_v43 = vand.u32 4294901760, %v15921_v58 }
 0x8f0   : > { %13783 = vmatprep.subr.bf16.mxu1 %v13782_v2  ;;  %13802 = vmatprep.subr.bf16.mxu0 %v14327_v9 }
 0x8f1   : > { %v10291_v22 = vsub.f32 %v15921_v58, %v10290_v43 }
 0x8f2   : > { %13104 = vmatmul.mubr.f32.gmra.mrb[14].mxu1 %v14449_v13  ;;  %v7757_v13 = vrot.slane %v7753_v10, %v14529_v37 }
 0x8f3   : > { %13110 = vmatprep.mubr.f32.mxu1 %v14653_v26 }
 0x8f4   : > { %vm7758_vm13 = vcmp.eq.s32.totalorder %v7757_v13, 1  ;;  %v10214_v13 = vld [vmem:[%s16049_s5] sm:$0xff] }
 0x8f6   : > { %13111 = vmatmul.mubr.f32.vlgmr.msra.gmra.mrb[12].mxu1 %v14658_v28 }
 0x8f7   : > { %13785 = vmatpush3.bf16.msra.mxu1 %v13782_v2  ;;  %13113 = vmatprep.mubr.f32.mxu1 %v14663_v33 }
 0x8f8   : > { %13787 = vmatprep.subr.bf16.mxu1 %v13786_v36 }
 0x8fa   : > { %13114 = vmatmul.mubr.f32.gmra.mrb[14].mxu1 %v14668_v40 }
 0x8fb   : > { %13120 = vmatprep.mubr.f32.mxu1 %v14583_v49 }
 0x8fe   : > { %13121 = vmatmul.mubr.f32.vlgmr.msra.gmra.mrb[12].mxu1 %v14594_v55 }
 0x8ff   : > { %13789 = vmatpush3.bf16.msra.mxu1 %v13786_v36  ;;  %13123 = vmatprep.mubr.f32.mxu1 %v14600_v57 }
 0x900   : > { %13791 = vmatprep.subr.msk.bf16.mxu1 %vm15821_vm9, %v16114_v61 }
 0x902   : > { %13124 = vmatmul.mubr.f32.gmra.mrb[14].mxu1 %v14617_v63 }
 0x903   : > { %13130 = vmatprep.mubr.f32.mxu1 %v14598_v56 }
 0x906   : > { %13131 = vmatmul.mubr.f32.vlgmr.msra.gmra.mrb[12].mxu1 %v14615_v62 }
 0x907   : > { %13793 = vmatpush3.bf16.msk.msra.mxu1 %vm15821_vm9, %v16114_v61  ;;  %13133 = vmatprep.mubr.f32.mxu1 %v14625_v1 }
 0x908   : > { %13795 = vmatprep.subr.bf16.mxu1 %v13794_v8 }
 0x90a   : > { %13134 = vmatmul.mubr.f32.gmra.mrb[14].mxu1 %v14635_v7 }
 0x90b   : > { %13140 = vmatprep.mubr.f32.mxu1 %v14622_v0 }
 0x90e   : > { %13141 = vmatmul.mubr.f32.vlgmr.msra.gmra.mrb[12].mxu1 %v14632_v6 }
 0x90f   : > { %13797 = vmatpush3.bf16.msra.mxu1 %v13794_v8  ;;  %13143 = vmatprep.mubr.f32.mxu1 %v14641_v17 }
 0x910   : > { %13799 = vmatprep.subr.msk.bf16.mxu1 %vm15821_vm9, %v16114_v61 }
 0x912   : > { %13144 = vmatmul.mubr.f32.gmra.mrb[14].mxu1 %v14647_v25 }
 0x913   : > { %13150 = vmatprep.mubr.f32.mxu1 %v14583_v49 }
 0x916   : > { %13151 = vmatmul.mubr.f32.vlgmr.msra.gmra.mrb[12].mxu1 %v14594_v55 }
 0x917   : > { %13801 = vmatpush3.bf16.msk.msra.mxu1 %vm15821_vm9, %v16114_v61  ;;  %13153 = vmatprep.mubr.f32.mxu1 %v14600_v57 }
 0x918   : > { %13808 = vmatprep.subr.bf16.mxu1 %v14327_v9 }
 0x91a   : > { %13154 = vmatmul.mubr.f32.gmra.mrb[14].mxu1 %v14617_v63 }
 0x91b   : > { %13160 = vmatprep.mubr.f32.mxu1 %v14583_v49  ;;  %v8993_v49 = vrot.slane %v8989_v39, %v14529_v37 }
 0x91d   : > { %vm8994_vm14 = vcmp.eq.s32.totalorder %v8993_v49, 1 }
 0x91e   : > { %13161 = vmatmul.mubr.f32.vlgmr.msra.gmra.mrb[12].mxu1 %v14594_v55  ;;  %v16212_v55 = vld [vmem:[#allocation14_spill] sm:$0xff] }
 0x91f   : > { %13163 = vmatprep.mubr.f32.mxu1 %v14600_v57  ;;  %v7759_v56 = vsel %vm7758_vm13, %v15648_v38, %v16212_v55  ;;  %v16213_v57 = vld [vmem:[#allocation5_spill] sm:$0xff] }
 0x920   : > { %v7760_v62 = vsel %vm7758_vm13, %v15653_v3, %v16213_v57  ;;  %v10292_v57 = vand.u32 4294901760, %v10291_v22 }
 0x921   : > { %v8996_v0 = vsel %vm8994_vm14, %v15799_v14, %v7760_v62 }
 0x922   : > { %13164 = vmatmul.mubr.f32.gmra.mrb[14].mxu1 %v14617_v63  ;;  %v8995_v63 = vsel %vm8994_vm14, %v15794_v32, %v7759_v56  ;;  %v10711_v6 = vand.u32 4294901760, %v8996_v0  ;;  %v16218_v32 = vld [vmem:[#allocation11_spill] sm:$0xff] }
 0x923   : > { %13185 = vmatprep.mubr.msk.f32.mxu1 %vm14328_vm10, %v16201_v52  ;;  %v10708_v1 = vand.u32 4294901760, %v8995_v63 }
 0x924   : > { %v15893_v17 = vsub.f32 %v8996_v0, %v10711_v6 }
 0x925   : > { %v15891_v7 = vsub.f32 %v8995_v63, %v10708_v1  ;;  %v15897_v28 = vpack.c.bf16 %v10711_v6, %v10708_v1  ;;  %v10705_v6 = vsel %vm926_vm3, %v10214_v13, 0 }
 0x926   : > { %v10794_v26 = vand.u32 4294901760, %v15893_v17 }
 0x927   : > { %v10787_v25 = vand.u32 4294901760, %v15891_v7  ;;  %v13845_v29 = vpack.c.bf16 %v15893_v17, %v15891_v7 }
 0x928   : > { %v10795_v40 = vsub.f32 %v15893_v17, %v10794_v26 }
 0x929   : > { %v10788_v33 = vsub.f32 %v15891_v7, %v10787_v25  ;;  %v15905_v30 = vpack.c.bf16 %v10794_v26, %v10787_v25 }
 0x92a   : > { %v10796_v38 = vand.u32 4294901760, %v10795_v40 }
 0x92b   : > { %v10789_v61 = vand.u32 4294901760, %v10788_v33 }
 0x92d   : > { %v15901_v3 = vpack.c.bf16 %v10796_v38, %v10789_v61  ;;  %v10774_v38 = vand.u32 4294901760, %v10705_v6 }
 0x92f   : > { %v10775_v50 = vsub.f32 %v10705_v6, %v10774_v38 }
 0x931   : > { %v10776_v4 = vand.u32 4294901760, %v10775_v50 }
 0x9f1   : > { %v13162_v23 = vpop.f32.mrb[12].mxu1 }
 0x9f2   : > { %v10200_v47 = vadd.f32 %v13162_v23, %v16180_v27  ;;  %v10177_v59 = vpop.f32.mrb[13].mxu1  ;;  %v10777_v23 = vsub.f32 %v10775_v50, %v10776_v4 }
 0x9f3   : > { %v10199_v5 = vadd.f32 %v10177_v59, %v16181_v46 }
 0x9f4   : > { %v10211_v11 = vsel %vm15916_vm1, %v10200_v47, %v16216_v19  ;;  %v10778_v54 = vand.u32 4294901760, %v10777_v23 }
 0x9f5   : > { %v10223_v37 = vand.u32 4294901760, %v10211_v11  ;;  %v10210_v44 = vsel %vm15916_vm1, %v10199_v5, %v16217_v60  ;;  %v13165_v35 = vpop.f32.mrb[14].mxu1 }
 0x9f6   : > { %v10220_v31 = vand.u32 4294901760, %v10210_v44  ;;  %v10202_v14 = vadd.f32 %v13165_v35, %v16218_v32  ;;  %v10189_v15 = vpop.f32.mrb[15].mxu1 }
 0x9f7   : > { %v10307_v27 = vsub.f32 %v10211_v11, %v10223_v37  ;;  %v10201_v34 = vadd.f32 %v10189_v15, %v16219_v16 }
 0x9f8   : > { %v10300_v46 = vsub.f32 %v10210_v44, %v10220_v31  ;;  %v10213_v18 = vsel %vm15916_vm1, %v10202_v14, %v16220_v42  ;;  %v13803_v51 = vpack.c.bf16 %v10223_v37, %v10220_v31 }
 0x9f9   : > { %v10308_v20 = vand.u32 4294901760, %v10307_v27  ;;  %v10229_v12 = vand.u32 4294901760, %v10213_v18  ;;  %v10212_v21 = vsel %vm15916_vm1, %v10201_v34, %v15763_v41 }
 0x9fa   : > { %v10301_v24 = vand.u32 4294901760, %v10300_v46  ;;  %v10226_v2 = vand.u32 4294901760, %v10212_v21  ;;  %13804 = vmatpush3.bf16.msra.mxu0 %v13803_v51  ;;  %v13815_v36 = vpack.c.bf16 %v10307_v27, %v10300_v46 }
 0x9fb   : > { %v10321_v8 = vsub.f32 %v10213_v18, %v10229_v12  ;;  %13805 = vmatprep.subr.bf16.mxu0 %v14327_v9  ;;  %v10309_v10 = vsub.f32 %v10307_v27, %v10308_v20 }
 0x9fc   : > { %v10314_v39 = vsub.f32 %v10212_v21, %v10226_v2  ;;  %v13806_v49 = vpack.c.bf16 %v10229_v12, %v10226_v2  ;;  %v10302_v55 = vsub.f32 %v10300_v46, %v10301_v24  ;;  %v13827_v41 = vpack.c.bf16 %v10308_v20, %v10301_v24  ;;  %v11170_v24 = vpop.permute.xlu0 %11169 }
 0x9fd   : > { %v10322_v56 = vand.u32 4294901760, %v10321_v8  ;;  %v10310_v62 = vand.u32 4294901760, %v10309_v10 }
 0x9fe   : > { %v10315_v63 = vand.u32 4294901760, %v10314_v39  ;;  %13807 = vmatpush3.bf16.msra.mxu0 %v13806_v49  ;;  %v10303_v0 = vand.u32 4294901760, %v10302_v55  ;;  %v13818_v1 = vpack.c.bf16 %v10321_v8, %v10314_v39 }
 0x9ff   : > { %13814 = vmatprep.subr.bf16.mxu0 %v14327_v9  ;;  %v10323_v25 = vsub.f32 %v10321_v8, %v10322_v56 }
 0xa00   : > { %v13809_v26 = vpack.c.bf16 %v10310_v62, %v10303_v0  ;;  %v10316_v33 = vsub.f32 %v10314_v39, %v10315_v63  ;;  %v13830_v40 = vpack.c.bf16 %v10322_v56, %v10315_v63 }
 0xa01   : > { %13175 = vmatmul.mubr.f32.vlgmr.msra.gmra.mrb[16].mxu0 %v10292_v57  ;;  %v10324_v61 = vand.u32 4294901760, %v10323_v25 }
 0xa02   : > { %13810 = vmatpush3.bf16.msra.mxu1 %v13809_v26  ;;  %13816 = vmatpush3.bf16.msra.mxu0 %v13815_v36  ;;  %v10317_v53 = vand.u32 4294901760, %v10316_v33 }
 0xa03   : > { %13811 = vmatprep.subr.bf16.mxu1 %v14327_v9  ;;  %13817 = vmatprep.subr.bf16.mxu0 %v14327_v9 }
 0xa04   : > { %v13812_v45 = vpack.c.bf16 %v10324_v61, %v10317_v53  ;;  %13196 = vmatprep.mubr.msk.f32.mxu0 %vm14328_vm10, %v16201_v52 }
 0xa06   : > { %13813 = vmatpush3.bf16.msra.mxu1 %v13812_v45  ;;  %13819 = vmatpush3.bf16.msra.mxu0 %v13818_v1 }
 0xa07   : > { %13820 = vmatprep.subr.bf16.mxu1 %v14327_v9  ;;  %13826 = vmatprep.subr.bf16.mxu0 %v14327_v9 }
 0xa09   : > { %13186 = vmatmul.mubr.f32.vlgmr.msra.gmra.mrb[16].mxu1 %v15914_v48  ;;  %13197 = vmatmul.mubr.f32.vlgmr.msra.gmra.mrb[18].mxu0 %v15921_v58 }
 0xa0a   : > { %13822 = vmatpush3.bf16.msra.mxu1 %v13803_v51  ;;  %13828 = vmatpush3.bf16.msra.mxu0 %v13827_v41 }
 0xa0b   : > { %13823 = vmatprep.subr.bf16.mxu1 %v14327_v9  ;;  %13829 = vmatprep.subr.bf16.mxu0 %v14327_v9 }
 0xa0c   : > { %13207 = vmatprep.mubr.msk.f32.mxu1 %vm14328_vm10, %v16201_v52  ;;  %13218 = vmatprep.mubr.msk.f32.mxu0 %vm14328_vm10, %v16201_v52 }
 0xa0e   : > { %13825 = vmatpush3.bf16.msra.mxu1 %v13806_v49  ;;  %13831 = vmatpush3.bf16.msra.mxu0 %v13830_v40 }
 0xa0f   : > { %13832 = vmatprep.subr.bf16.mxu1 %v14327_v9  ;;  %13838 = vmatprep.subr.bf16.mxu0 %v14327_v9 }
 0xa11   : > { %13208 = vmatmul.mubr.f32.vlgmr.msra.gmra.mrb[18].mxu1 %v10290_v43  ;;  %13219 = vmatmul.mubr.f32.vlgmr.msra.gmra.mrb[20].mxu0 %v15914_v48 }
 0xa12   : > { %13834 = vmatpush3.bf16.msra.mxu1 %v13803_v51  ;;  %13840 = vmatpush3.bf16.msra.mxu0 %v15897_v28 }
 0xa13   : > { %13835 = vmatprep.subr.bf16.mxu1 %v14327_v9  ;;  %13229 = vmatprep.mubr.msk.f32.mxu1 %vm14328_vm10, %v16201_v52 }
 0xa14   : > { %13236 = vmatprep.mubr.msk.f32.mxu0 %vm14328_vm10, %v16201_v52  ;;  %13841 = vmatprep.subr.bf16.mxu0 %v14327_v9 }
 0xa15   : > { %13237 = vmatmul.mubr.f32.vlgmr.msra.gmra.mrb[22].mxu0 %v10778_v54 }
 0xa16   : > { %13837 = vmatpush3.bf16.msra.mxu1 %v13806_v49  ;;  %13843 = vmatpush3.bf16.msra.mxu0 %v15901_v3 }
 0xa17   : > { %13844 = vmatprep.subr.bf16.mxu1 %v14327_v9  ;;  %13243 = vmatprep.mubr.msk.f32.mxu0 %vm14328_vm10, %v16201_v52 }
 0xa18   : > { %13847 = vmatprep.subr.bf16.mxu0 %v14327_v9 }
 0xa19   : > { %13230 = vmatmul.mubr.f32.vlgmr.msra.gmra.mrb[20].mxu1 %v15914_v48  ;;  %13244 = vmatmul.mubr.f32.vlgmr.msra.gmra.mrb[24].mxu0 %v10774_v38 }
 0xa1a   : > { %13846 = vmatpush3.bf16.msra.mxu1 %v13845_v29  ;;  %13250 = vmatprep.mubr.msk.f32.mxu1 %vm14328_vm10, %v16201_v52 }
 0xa1b   : > { %13849 = vmatpush3.bf16.msra.mxu0 %v15897_v28  ;;  %13850 = vmatprep.subr.bf16.mxu1 %v14327_v9 }
 0xa1c   : > { %13257 = vmatprep.mubr.msk.f32.mxu0 %vm14328_vm10, %v16201_v52  ;;  %13853 = vmatprep.subr.bf16.mxu0 %v14327_v9 }
 0xa1d   : > { %13251 = vmatmul.mubr.f32.vlgmr.msra.gmra.mrb[22].mxu1 %v10775_v50 }
 0xa1e   : > { %13852 = vmatpush3.bf16.msra.mxu1 %v15905_v30  ;;  %13258 = vmatmul.mubr.f32.vlgmr.msra.gmra.mrb[26].mxu0 %v10776_v4 }
 0xa1f   : > { %13264 = vmatprep.mubr.msk.f32.mxu1 %vm14328_vm10, %v16201_v52  ;;  %13855 = vmatpush3.bf16.msra.mxu0 %v15897_v28 }
 0xa20   : > { %13271 = vmatprep.mubr.msk.f32.mxu0 %vm14328_vm10, %v16201_v52 }
 0xa21   : > { %13265 = vmatmul.mubr.f32.vlgmr.msra.gmra.mrb[24].mxu1 %v10774_v38 }
 0xa22   : > { %13272 = vmatmul.mubr.f32.vlgmr.msra.gmra.mrb[28].mxu0 %v10774_v38 }
 0xad4   : > { %v10294_v7 = vpop.f32.mrb[16].mxu0 }
 0xad5   : > { %v13176_v17 = vpop.f32.mrb[17].mxu0 }
 0xadc   : > { %v10385_v3 = vpop.f32.mrb[16].mxu1  ;;  %v10465_v29 = vpop.f32.mrb[18].mxu0 }
 0xadd   : > { %v10386_v48 = vadd.f32 %v10385_v3, %v10294_v7  ;;  %v13187_v9 = vpop.f32.mrb[17].mxu1  ;;  %v13198_v58 = vpop.f32.mrb[19].mxu0 }
 0xadf   : > { %v10466_v47 = vadd.f32 %v10465_v29, %v10386_v48 }
 0xae4   : > { %v10542_v30 = vpop.f32.mrb[18].mxu1  ;;  %v10625_v59 = vpop.f32.mrb[20].mxu0 }
 0xae5   : > { %v10543_v5 = vadd.f32 %v10542_v30, %v10466_v47  ;;  %v13209_v19 = vpop.f32.mrb[19].mxu1  ;;  %v13220_v11 = vpop.f32.mrb[21].mxu0 }
 0xae7   : > { %v10626_v37 = vadd.f32 %v10625_v59, %v10543_v5 }
 0xae8   : > { %v10780_v28 = vpop.f32.mrb[22].mxu0 }
 0xae9   : > { %v13238_v60 = vpop.f32.mrb[23].mxu0 }
 0xaec   : > { %v10700_v44 = vpop.f32.mrb[20].mxu1  ;;  %v10861_v52 = vpop.f32.mrb[24].mxu0 }
 0xaed   : > { %v10701_v35 = vadd.f32 %v10700_v44, %v10626_v37  ;;  %v13231_v43 = vpop.f32.mrb[21].mxu1  ;;  %v13245_v31 = vpop.f32.mrb[25].mxu0 }
 0xaef   : > { %v10781_v32 = vadd.f32 %v10780_v28, %v10701_v35 }
 0xaf0   : > { %v10937_v14 = vpop.f32.mrb[22].mxu1 }
 0xaf1   : > { %v10862_v15 = vadd.f32 %v10861_v52, %v10781_v32  ;;  %v13252_v27 = vpop.f32.mrb[23].mxu1  ;;  %v11012_v16 = vpop.f32.mrb[26].mxu0 }
 0xaf2   : > { %v13259_v34 = vpop.f32.mrb[27].mxu0 }
 0xaf3   : > { %v10938_v46 = vadd.f32 %v10937_v14, %v10862_v15 }
 0xaf4   : > { %v11089_v42 = vpop.f32.mrb[24].mxu1 }
 0xaf5   : > { %v11013_v18 = vadd.f32 %v11012_v16, %v10938_v46  ;;  %v13266_v51 = vpop.f32.mrb[25].mxu1  ;;  %v11162_v20 = vpop.f32.mrb[28].mxu0 }
 0xaf6   : > { %v13273_v12 = vpop.f32.mrb[29].mxu0 }
 0xaf7   : > { %v11090_v21 = vadd.f32 %v11089_v42, %v11013_v18 }
 0xaf9   : > { %v11163_v22 = vadd.f32 %v11162_v20, %v11090_v21 }
 0xafb   : > { %v11172_v2 = vadd.f32 %v11170_v24, %v11163_v22 }
 0xafd   : > { %v11173_v36 = vrot.slane %v11172_v2, 4 }
 0xaff   : > { %v11174_v8 = vmax.f32 %v11172_v2, %v11173_v36 }
 0xb01   : > { %v11175_v10 = vrot.slane %v11174_v8, 2 }
 0xb03   : > { %v11176_v13 = vmax.f32 %v11174_v8, %v11175_v10 }
 0xb05   : > { %v11177_v39 = vrot.slane %v11176_v13, 1 }
 0xb07   : > { %v11178_v49 = vmax.f32 %v11176_v13, %v11177_v39 }
 0xb09   : > { %v11179_v55 = vsub.f32 %v11172_v2, %v11178_v49 }
 0xb0b   : > { %v11180_v41 = vmul.f32 1.442695, %v11179_v55 }
 0xb0d   : > { %14254 = vpow2.f32 %v11180_v41 }
 0xb17   : > { %v14255_v56 = vpop.eup %14254 }
 0xb18   : > { %v11182_v57 = vrot.slane %v14255_v56, 4 }
 0xb1a   : > { %v11183_v62 = vadd.f32 %v14255_v56, %v11182_v57 }
 0xb1c   : > { %v11184_v63 = vrot.slane %v11183_v62, 2 }
 0xb1e   : > { %v11185_v0 = vadd.f32 %v11184_v63, %v11183_v62 }
 0xb20   : > { %v11186_v1 = vrot.slane %v11185_v0, 1 }
 0xb22   : > { %v11187_v6 = vadd.f32 %v11186_v1, %v11185_v0 }
 0xb24   : > { %14256 = vlog2.f32 %v11187_v6 }
 0xb2e   : > { %v14257_v25 = vpop.eup %14256 }
 0xb2f   : > { %v11189_v26 = vmul.f32 0.6931472, %v14257_v25 }
 0xb31   : > { %v11190_v33 = vsub.f32 %v11179_v55, %v11189_v26 }
 0xb33   : > { %11191 = vst [vmem:[%s307_s19] sm:$0xff] %v11190_v33 }
 0xb34   : > { %14273 = shalt.err (!%p14270_p3)
}
 0xb35   : > { %s14274_s12 = scalar_lea.hbm %s16002_s24, 128  ;;  %s14278_s18 = scalar_lea.hbm %s16052_s8, 256 }
 0xb36   : > { %p14275_p4 = scmp.ne.s32.totalorder %s16002_s24, %s14274_s12  ;;  %p14279_p9 = scmp.lt.u32.totalorder %s16002_s24, %s16052_s8 }
 0xb37   : > { %p14280_p10 = scmp.lt.u32.totalorder %s14278_s18, %s14274_s12  ;;  %p14282_p12 = scmp.lt.u32.totalorder %s14274_s12, %s16002_s24 }
 0xb38   : > { %p14276_p7 = pnand %p14275_p4, %p14413_p5 }
 0xb39   : > { %p14281_p11 = por %p14280_p10, %p14279_p9 }
 0xb3a   : > { %p14277_p8 = pneg %p14276_p7 }
 0xb3b   : > { %p14283_p13 = por %p14282_p12, %p14281_p11 }
 0xb3d   : > { %p14284_p0 = pnand %p14283_p13, %p14277_p8 }
 0xb3f   : > { %14287 = shalt.err (!%p14284_p0)
}
 0xb40   : > { %14208 = dma.vmem_to_hbm [thread:$0]  (%p14413_p5), %s16004_s20, 128, %s16002_s24, %s11193_s25  }
 0xb41 PF: > { %p14214_p1 = scmp.ge.s32.totalorder %s14322_s30, 2  ;;  %s11218_s23 = sand.u32 1, %s14310_s27  }
 0xb42   : > { %s11219_s22 = scalar_lea.sflag [#allocation3], %s11218_s23 }
 0xb43   : > { %p14211_p2 = pnand %p14214_p1, %p14417_p6 }
 0xb45   : > { %14305 = dma.done.wait (!%p14211_p2), %s11219_s22, 128  }
 0xb46   : > { %14307 = vsyncadd (!%p14211_p2), %s11219_s22, 4294967168  ;;  %p18_p3 = scmp.ge.s32.totalorder %s14400_s11, 4   ;;  %s16221_s27 = smov %s14314_s28 }
 0xb47   : > { %s16222_s28 = smov %s14318_s29  ;;  %s16223_s29 = smov %s14411_s14 }
 0xb48   : > { %s16224_s30 = smov %s14400_s11  ;;  %20 = sbr.rel (!%p18_p3) target bundleno = 3 (0x3), region = 90 }
 0xb4f   :  { %11224 = vsyncpa [#allocation3], 1 }
 0xb50   :  { %11226 = vsyncpa [#allocation3 + $0x1], 1 }

</bundles_post_ra>
